<compile_context>
chip_gen: v7x
topology: tpu7x:2x2x1
jax: 0.10.0
libtpu: 0.0.40
codegen_flags: <defaults>
</compile_context>

<pallas_src>
import functools
import math

import jax
import jax.numpy as jnp
import numpy as np
from jax import lax
from jax.experimental import pallas as pl
from jax.experimental.pallas import tpu as pltpu


_BIG_NEG = -1e30  # finite stand-in for -inf (avoids inf - inf = nan in the online max)


def _round_up(x, m):
    return ((x + m - 1) // m) * m


def _pick_tile(batch, dim):
    """Square row/col tile: lane-dense (>=128); bigger tiles cut key-stream HBM re-reads."""
    for t in (512, 256, 128):
        b_pad = _round_up(batch, t)
        if t > 128 and (b_pad - batch) * 8 > batch:
            continue  # too much padding waste for this batch size
        # q + k streams, double-buffered f32, plus (t, t) f32 temporaries for the sim/exp tile.
        vmem = 2 * 2 * t * dim * 4 + 4 * t * t * 4
        if vmem <= 40 * 1024 * 1024:
            return t
    return 128


def _ntxent_kernel(q_ref, k_ref, out_ref, m_ref, s_ref, pos_ref, *,
                   batch, b_pad, tile, shift_blocks, inv_temp, fixed_shift):
    """One (query-tile, key-tile) step of the online NT-Xent loss."""
    qi = pl.program_id(0)
    ki = pl.program_id(1)
    t = tile
    pad = b_pad - batch          # trace-time constant
    n_pad = 2 * b_pad

    # ---- per-row-tile init ----------------------------------------------------
    @pl.when(ki == 0)
    def _init():
        s_ref[...] = jnp.zeros_like(s_ref)
        if not fixed_shift:
            m_ref[...] = jnp.full_like(m_ref, _BIG_NEG)

    # ---- similarity tile on the MXU (inputs pre-normalized & pre-scaled by sqrt(1/T)) ----
    s = lax.dot_general(q_ref[...], k_ref[...], (((1,), (1,)), ((), ())),
                        preferred_element_type=jnp.float32)

    # ---- positive logit: local diagonal of the pair-shifted key tile ------------
    paired = (qi + shift_blocks) % pl.num_programs(0)

    @pl.when(ki == paired)
    def _pos():
        rr = lax.broadcasted_iota(jnp.int32, (t, t), 0)
        cc = lax.broadcasted_iota(jnp.int32, (t, t), 1)
        pos_ref[...] = jnp.sum(jnp.where(rr == cc, s, 0.0), axis=-1, keepdims=True)

    # ---- online logsumexp accumulation ------------------------------------------
    # Only the self tile (ki == qi) and the <= 2 key tiles that contain padded
    # columns need masking; every other (hot-path) tile is mask-free.
    if pad:
        pad_blk0 = b_pad // t - 1        # last block of the first half
        pad_blk1 = n_pad // t - 1        # last block of the second half
        needs_mask = (ki == qi) | (ki == pad_blk0) | (ki == pad_blk1)
    else:
        needs_mask = ki == qi

    def drop_mask():
        row = qi * t + lax.broadcasted_iota(jnp.int32, (t, t), 0)
        col = ki * t + lax.broadcasted_iota(jnp.int32, (t, t), 1)
        drop = row == col                                   # self-similarity
        if pad:                                             # padded (zero) columns
            drop = drop | ((col >= batch) & (col < b_pad)) | (col >= b_pad + batch)
        return drop

    if fixed_shift:
        # Cosine logits are bounded by inv_temp -> fixed shift, no per-row max and
        # no accumulator rescale.
        e = jnp.exp(s - inv_temp)

        @pl.when(jnp.logical_not(needs_mask))
        def _hot():
            s_ref[...] += jnp.sum(e, axis=-1, keepdims=True)

        @pl.when(needs_mask)
        def _masked():
            em = jnp.where(drop_mask(), 0.0, e)
            s_ref[...] += jnp.sum(em, axis=-1, keepdims=True)
    else:
        def online_update(drop):
            sm = s if drop is None else jnp.where(drop, _BIG_NEG, s)
            m_tile = jnp.max(sm, axis=-1, keepdims=True)
            m_new = jnp.maximum(m_ref[...], m_tile)
            e = jnp.exp(s - m_new)
            if drop is not None:
                e = jnp.where(drop, 0.0, e)   # select (not arithmetic) -> inf is discarded safely
            s_ref[...] = (s_ref[...] * jnp.exp(m_ref[...] - m_new)
                          + jnp.sum(e, axis=-1, keepdims=True))
            m_ref[...] = m_new

        @pl.when(jnp.logical_not(needs_mask))
        def _hot():
            online_update(None)

        @pl.when(needs_mask)
        def _masked():
            online_update(drop_mask())

    # ---- finalize: per-row (logsumexp - positive), zeroed for padded rows --------
    @pl.when(ki == pl.num_programs(1) - 1)
    def _finalize():
        shift = inv_temp if fixed_shift else m_ref[...]
        contrib = shift + jnp.log(s_ref[...]) - pos_ref[...]
        if pad:
            rid = qi * t + lax.broadcasted_iota(jnp.int32, (t, 1), 0)
            row_real = (rid < batch) | ((rid >= b_pad) & (rid < b_pad + batch))
            contrib = jnp.where(row_real, contrib, 0.0)
        out_ref[...] = contrib


def ntxent_loss(zis, zjs, *, temperature=0.5, use_cosine_similarity=True,
                bf16_matmul=False):
    """NTXentLoss.forward(zis, zjs): CrossEntropy(sum) over [pos | negatives]/T, / (2B)."""
    assert zis.shape == zjs.shape and zis.ndim == 2
    batch, dim = zis.shape
    inv_temp = 1.0 / float(temperature)
    t = _pick_tile(batch, dim)
    b_pad = _round_up(batch, t)
    n_pad = 2 * b_pad
    pad = b_pad - batch

    # Single concat of the two views; each half is padded with zeros so a row tile never
    # straddles the zjs/zis boundary and the paired tile is a pure block shift.
    if pad:
        z = jnp.zeros((pad, dim), zis.dtype)
        reps = jnp.concatenate([zjs, z, zis, z], axis=0)
    else:
        reps = jnp.concatenate([zjs, zis], axis=0)

    # Hoisted out of the kernel's hot loop:
    #  * cosine: normalize rows once (clamps ||r||^2 at 1e-8; torch clamps the product of
    #    norms at 1e-8 -- differs only for near-zero-norm embeddings).
    #  * fold 1/T into the operands via sqrt(1/T), so tiles come off the MXU as logits.
    reps = reps.astype(jnp.float32)
    if use_cosine_similarity:
        sq = jnp.sum(reps * reps, axis=-1, keepdims=True)
        reps = reps * lax.rsqrt(jnp.maximum(sq, 1e-8))
    reps = reps * jnp.float32(math.sqrt(inv_temp))
    if bf16_matmul:
        # Optional: halves HBM/VMEM stream bytes and uses the bf16 MXU rate (lower precision).
        reps = reps.astype(jnp.bfloat16)

    num_q = n_pad // t
    shift_blocks = b_pad // t
    # Cosine logits are bounded by 1/T, so a fixed logsumexp shift is safe for ordinary
    # temperatures; fall back to the online-max recurrence for tiny T (or the dot path).
    fixed_shift = bool(use_cosine_similarity) and inv_temp <= 32.0

    kernel = functools.partial(
        _ntxent_kernel,
        batch=batch, b_pad=b_pad, tile=t, shift_blocks=shift_blocks,
        inv_temp=inv_temp, fixed_shift=fixed_shift)

    per_row = pl.pallas_call(
        kernel,
        out_shape=jax.ShapeDtypeStruct((n_pad, 1), jnp.float32),
        grid=(num_q, num_q),
        in_specs=[
            # Query rows: constant across the key axis -> DMA'd once per row tile.
            pl.BlockSpec((t, dim), lambda qi, ki: (qi, 0)),
            # Key rows: streamed along the reduction axis.
            pl.BlockSpec((t, dim), lambda qi, ki: (ki, 0)),
        ],
        out_specs=pl.BlockSpec((t, 1), lambda qi, ki: (qi, 0)),
        scratch_shapes=[
            pltpu.VMEM((t, 1), jnp.float32),  # running max (online-max path only)
            pltpu.VMEM((t, 1), jnp.float32),  # running sum of exp
            pltpu.VMEM((t, 1), jnp.float32),  # positive logit per row
        ],
        compiler_params=pltpu.CompilerParams(
            dimension_semantics=("parallel", "arbitrary"),
            vmem_limit_bytes=48 * 1024 * 1024),
    )(reps, reps)

    # Tiny O(n) epilogue kept outside so the row-tile axis can stay "parallel".
    return jnp.sum(per_row) / (2 * batch)


def _ntxent_ref(zis, zjs, temperature, use_cosine):
    """Pure-JAX reference mirroring the PyTorch module literally."""
    b = zis.shape[0]
    n = 2 * b
    reps = jnp.concatenate([zjs, zis], axis=0)
    if use_cosine:
        nrm = jnp.linalg.norm(reps, axis=-1, keepdims=True)
        sim = (reps @ reps.T) / jnp.maximum(nrm * nrm.T, 1e-8)
    else:
        sim = reps @ reps.T
    l_pos = jnp.diagonal(sim, offset=b)
    r_pos = jnp.diagonal(sim, offset=-b)
    positives = jnp.concatenate([l_pos, r_pos]).reshape(n, 1)
    mask = ~(np.eye(n, dtype=bool)
             | np.eye(n, k=b, dtype=bool)
             | np.eye(n, k=-b, dtype=bool))
    negatives = sim[mask].reshape(n, n - 2)
    logits = jnp.concatenate([positives, negatives], axis=1) / temperature
    lse = jax.scipy.special.logsumexp(logits, axis=-1)
    loss = jnp.sum(lse - logits[:, 0])
    return loss / n


if __name__ == "__main__":
    key = jax.random.PRNGKey(0)
    tests = [
        dict(batch=4, hidden=32, temperature=0.5, cosine=True, bf16=False),    # heavy padding
        dict(batch=128, hidden=32, temperature=0.5, cosine=True, bf16=False),  # no padding, hot path
        dict(batch=12, hidden=32, temperature=0.2, cosine=True, bf16=False),   # padding + pairing
        dict(batch=4, hidden=32, temperature=0.5, cosine=False, bf16=False),   # dot path (online max)
        dict(batch=8, hidden=32, temperature=0.01, cosine=True, bf16=False),   # tiny-T fallback
        dict(batch=8, hidden=32, temperature=0.5, cosine=True, bf16=True),     # bf16 MXU option
    ]
    for i, cfg in enumerate(tests):
        k1, k2 = jax.random.split(jax.random.fold_in(key, i))
        zis = jax.random.normal(k1, (cfg["batch"], cfg["hidden"]), dtype=jnp.float32)
        zjs = jax.random.normal(k2, (cfg["batch"], cfg["hidden"]), dtype=jnp.float32)

        loss = ntxent_loss(zis, zjs, temperature=cfg["temperature"],
                           use_cosine_similarity=cfg["cosine"],
                           bf16_matmul=cfg["bf16"])
        loss = jax.block_until_ready(loss)

        ref = _ntxent_ref(zis, zjs, cfg["temperature"], cfg["cosine"])
        rtol, atol = (2e-2, 2e-3) if cfg["bf16"] else (1e-4, 1e-5)
        np.testing.assert_allclose(np.asarray(loss), np.asarray(ref), rtol=rtol, atol=atol)

    print("KERNEL_OK")
</pallas_src>

<mosaic_0001>
module attributes {stable_mosaic.version = 11 : i64} {
  func.func @_ntxent_kernel(%arg0: i32, %arg1: i32, %arg2: memref<128x32xf32, #tpu.memory_space<vmem>>, %arg3: memref<128x32xf32, #tpu.memory_space<vmem>>, %arg4: memref<128x1xf32, #tpu.memory_space<vmem>>, %arg5: memref<128x1xf32, #tpu.memory_space<vmem>>, %arg6: memref<128x1xf32, #tpu.memory_space<vmem>>, %arg7: memref<128x1xf32, #tpu.memory_space<vmem>>) attributes {dimension_semantics = [#tpu.dimension_semantics<parallel>, #tpu.dimension_semantics<arbitrary>], iteration_bounds = array<i64: 2, 2>, scalar_prefetch = 0 : i64, scratch_operands = 3 : i64, tpu.core_type = #tpu.core_type<tc>, window_params = [{transform_indices = @transform_0, window_bounds = array<i64: 128, 32>}, {transform_indices = @transform_1, window_bounds = array<i64: 128, 32>}, {transform_indices = @transform_2, window_bounds = array<i64: 128, 1>}]} {
    %c0_i32 = arith.constant 0 : i32
    %0 = arith.cmpi eq, %arg1, %c0_i32 : i32
    %1 = arith.extui %0 : i1 to i32
    %c0_i32_0 = arith.constant 0 : i32
    %2 = arith.cmpi ne, %1, %c0_i32_0 : i32
    scf.if %2 {
      %cst_17 = arith.constant 0.000000e+00 : f32
      %36 = vector.broadcast %cst_17 : f32 to vector<128x1xf32>
      %c0_18 = arith.constant 0 : index
      %c0_19 = arith.constant 0 : index
      %37 = vector.load %arg6[%c0_18, %c0_19] : memref<128x1xf32, #tpu.memory_space<vmem>>, vector<128x1xf32>
      tpu.vector_store %arg6[%c0_18, %c0_19], %36 {strides = array<i32>} : memref<128x1xf32, #tpu.memory_space<vmem>>, vector<128x1xf32>,
    } else {
    }
    %c0 = arith.constant 0 : index
    %c0_1 = arith.constant 0 : index
    %3 = vector.load %arg2[%c0, %c0_1] : memref<128x32xf32, #tpu.memory_space<vmem>>, vector<128x32xf32>
    %c0_2 = arith.constant 0 : index
    %c0_3 = arith.constant 0 : index
    %4 = vector.load %arg3[%c0_2, %c0_3] : memref<128x32xf32, #tpu.memory_space<vmem>>, vector<128x32xf32>
    %cst = arith.constant dense<0.000000e+00> : vector<128x128xf32>
    %5 = tpu.matmul %3, %4, %cst {dimension_numbers = #tpu.dot_dimension_numbers<[1], [1], [0], [0], [0, 0, 1, 0], [], []>} : vector<128x32xf32>, vector<128x32xf32>, vector<128x128xf32> -> vector<128x128xf32>
    %c1_i32 = arith.constant 1 : i32
    %6 = arith.addi %arg0, %c1_i32 : i32
    %c2_i32 = arith.constant 2 : i32
    %c0_i32_4 = arith.constant 0 : i32
    %7 = arith.cmpi eq, %c2_i32, %c0_i32_4 : i32
    %c1_i32_5 = arith.constant 1 : i32
    %8 = arith.select %7, %c1_i32_5, %c2_i32 : i32
    %9 = arith.remsi %6, %8 : i32
    %c0_i32_6 = arith.constant 0 : i32
    %10 = arith.cmpi ne, %9, %c0_i32_6 : i32
    %c0_i32_7 = arith.constant 0 : i32
    %11 = arith.cmpi slt, %9, %c0_i32_7 : i32
    %c0_i32_8 = arith.constant 0 : i32
    %12 = arith.cmpi slt, %8, %c0_i32_8 : i32
    %13 = arith.xori %11, %12 : i1
    %14 = arith.andi %13, %10 : i1
    %15 = arith.addi %9, %8 : i32
    %16 = arith.select %14, %15, %9 : i32
    %17 = arith.cmpi eq, %arg1, %16 : i32
    %18 = arith.extui %17 : i1 to i32
    %c0_i32_9 = arith.constant 0 : i32
    %19 = arith.cmpi ne, %18, %c0_i32_9 : i32
    scf.if %19 {
      %36 = tpu.iota {dimensions = array<i32: 0>} : vector<128x128xi32>
      %37 = tpu.iota {dimensions = array<i32: 1>} : vector<128x128xi32>
      %38 = arith.cmpi eq, %36, %37 : vector<128x128xi32>
      %cst_17 = arith.constant 0.000000e+00 : f32
      %39 = vector.broadcast %cst_17 : f32 to vector<128x128xf32>
      %40 = arith.select %38, %5, %39 : vector<128x128xi1>, vector<128x128xf32>
      %cst_18 = arith.constant dense<0.000000e+00> : vector<128xf32>
      %41 = vector.multi_reduction <add>, %40, %cst_18 [1] : vector<128x128xf32> to vector<128xf32>
      %42 = vector.shape_cast %41 : vector<128xf32> to vector<128x1xf32>
      %c0_19 = arith.constant 0 : index
      %c0_20 = arith.constant 0 : index
      %43 = vector.load %arg7[%c0_19, %c0_20] : memref<128x1xf32, #tpu.memory_space<vmem>>, vector<128x1xf32>
      tpu.vector_store %arg7[%c0_19, %c0_20], %42 {strides = array<i32>} : memref<128x1xf32, #tpu.memory_space<vmem>>, vector<128x1xf32>,
    } else {
    }
    %20 = arith.cmpi eq, %arg1, %arg0 : i32
    %c0_i32_10 = arith.constant 0 : i32
    %21 = arith.cmpi eq, %arg1, %c0_i32_10 : i32
    %22 = arith.ori %20, %21 : i1
    %c1_i32_11 = arith.constant 1 : i32
    %23 = arith.cmpi eq, %arg1, %c1_i32_11 : i32
    %24 = arith.ori %22, %23 : i1
    %cst_12 = arith.constant 2.000000e+00 : f32
    %25 = vector.broadcast %cst_12 : f32 to vector<128x128xf32>
    %26 = arith.subf %5, %25 : vector<128x128xf32>
    %27 = math.exp %26 : vector<128x128xf32>
    %true = arith.constant true
    %28 = arith.xori %24, %true : i1
    %29 = arith.extui %28 : i1 to i32
    %c0_i32_13 = arith.constant 0 : i32
    %30 = arith.cmpi ne, %29, %c0_i32_13 : i32
    scf.if %30 {
      %c0_17 = arith.constant 0 : index
      %c0_18 = arith.constant 0 : index
      %36 = vector.load %arg6[%c0_17, %c0_18] : memref<128x1xf32, #tpu.memory_space<vmem>>, vector<128x1xf32>
      %cst_19 = arith.constant dense<0.000000e+00> : vector<128xf32>
      %37 = vector.multi_reduction <add>, %27, %cst_19 [1] : vector<128x128xf32> to vector<128xf32>
      %38 = vector.shape_cast %37 : vector<128xf32> to vector<128x1xf32>
      %39 = arith.addf %36, %38 : vector<128x1xf32>
      %c0_20 = arith.constant 0 : index
      %c0_21 = arith.constant 0 : index
      %40 = vector.load %arg6[%c0_20, %c0_21] : memref<128x1xf32, #tpu.memory_space<vmem>>, vector<128x1xf32>
      tpu.vector_store %arg6[%c0_20, %c0_21], %39 {strides = array<i32>} : memref<128x1xf32, #tpu.memory_space<vmem>>, vector<128x1xf32>,
    } else {
    }
    %31 = arith.extui %24 : i1 to i32
    %c0_i32_14 = arith.constant 0 : i32
    %32 = arith.cmpi ne, %31, %c0_i32_14 : i32
    scf.if %32 {
      %c128_i32 = arith.constant 128 : i32
      %36 = arith.muli %arg0, %c128_i32 : i32
      %37 = tpu.iota {dimensions = array<i32: 0>} : vector<128x128xi32>
      %38 = vector.broadcast %36 : i32 to vector<128x128xi32>
      %39 = arith.addi %38, %37 : vector<128x128xi32>
      %c128_i32_17 = arith.constant 128 : i32
      %40 = arith.muli %arg1, %c128_i32_17 : i32
      %41 = tpu.iota {dimensions = array<i32: 1>} : vector<128x128xi32>
      %42 = vector.broadcast %40 : i32 to vector<128x128xi32>
      %43 = arith.addi %42, %41 : vector<128x128xi32>
      %44 = arith.cmpi eq, %39, %43 : vector<128x128xi32>
      %c4_i32 = arith.constant 4 : i32
      %45 = vector.broadcast %c4_i32 : i32 to vector<128x128xi32>
      %46 = arith.cmpi sge, %43, %45 : vector<128x128xi32>
      %c128_i32_18 = arith.constant 128 : i32
      %47 = vector.broadcast %c128_i32_18 : i32 to vector<128x128xi32>
      %48 = arith.cmpi slt, %43, %47 : vector<128x128xi32>
      %49 = arith.andi %46, %48 : vector<128x128xi1>
      %50 = arith.ori %44, %49 : vector<128x128xi1>
      %c132_i32 = arith.constant 132 : i32
      %51 = vector.broadcast %c132_i32 : i32 to vector<128x128xi32>
      %52 = arith.cmpi sge, %43, %51 : vector<128x128xi32>
      %53 = arith.ori %50, %52 : vector<128x128xi1>
      %cst_19 = arith.constant 0.000000e+00 : f32
      %54 = vector.broadcast %cst_19 : f32 to vector<128x128xf32>
      %55 = arith.select %53, %54, %27 : vector<128x128xi1>, vector<128x128xf32>
      %c0_20 = arith.constant 0 : index
      %c0_21 = arith.constant 0 : index
      %56 = vector.load %arg6[%c0_20, %c0_21] : memref<128x1xf32, #tpu.memory_space<vmem>>, vector<128x1xf32>
      %cst_22 = arith.constant dense<0.000000e+00> : vector<128xf32>
      %57 = vector.multi_reduction <add>, %55, %cst_22 [1] : vector<128x128xf32> to vector<128xf32>
      %58 = vector.shape_cast %57 : vector<128xf32> to vector<128x1xf32>
      %59 = arith.addf %56, %58 : vector<128x1xf32>
      %c0_23 = arith.constant 0 : index
      %c0_24 = arith.constant 0 : index
      %60 = vector.load %arg6[%c0_23, %c0_24] : memref<128x1xf32, #tpu.memory_space<vmem>>, vector<128x1xf32>
      tpu.vector_store %arg6[%c0_23, %c0_24], %59 {strides = array<i32>} : memref<128x1xf32, #tpu.memory_space<vmem>>, vector<128x1xf32>,
    } else {
    }
    %c1_i32_15 = arith.constant 1 : i32
    %33 = arith.cmpi eq, %arg1, %c1_i32_15 : i32
    %34 = arith.extui %33 : i1 to i32
    %c0_i32_16 = arith.constant 0 : i32
    %35 = arith.cmpi ne, %34, %c0_i32_16 : i32
    scf.if %35 {
      %c0_17 = arith.constant 0 : index
      %c0_18 = arith.constant 0 : index
      %36 = vector.load %arg6[%c0_17, %c0_18] : memref<128x1xf32, #tpu.memory_space<vmem>>, vector<128x1xf32>
      %37 = math.log %36 : vector<128x1xf32>
      %cst_19 = arith.constant 2.000000e+00 : f32
      %38 = vector.broadcast %cst_19 : f32 to vector<128x1xf32>
      %39 = arith.addf %38, %37 : vector<128x1xf32>
      %c0_20 = arith.constant 0 : index
      %c0_21 = arith.constant 0 : index
      %40 = vector.load %arg7[%c0_20, %c0_21] : memref<128x1xf32, #tpu.memory_space<vmem>>, vector<128x1xf32>
      %41 = arith.subf %39, %40 : vector<128x1xf32>
      %c128_i32 = arith.constant 128 : i32
      %42 = arith.muli %arg0, %c128_i32 : i32
      %43 = tpu.iota {dimensions = array<i32: 0>} : vector<128x1xi32>
      %44 = vector.broadcast %42 : i32 to vector<128x1xi32>
      %45 = arith.addi %44, %43 : vector<128x1xi32>
      %c4_i32 = arith.constant 4 : i32
      %46 = vector.broadcast %c4_i32 : i32 to vector<128x1xi32>
      %47 = arith.cmpi slt, %45, %46 : vector<128x1xi32>
      %c128_i32_22 = arith.constant 128 : i32
      %48 = vector.broadcast %c128_i32_22 : i32 to vector<128x1xi32>
      %49 = arith.cmpi sge, %45, %48 : vector<128x1xi32>
      %c132_i32 = arith.constant 132 : i32
      %50 = vector.broadcast %c132_i32 : i32 to vector<128x1xi32>
      %51 = arith.cmpi slt, %45, %50 : vector<128x1xi32>
      %52 = arith.andi %49, %51 : vector<128x1xi1>
      %53 = arith.ori %47, %52 : vector<128x1xi1>
      %cst_23 = arith.constant 0.000000e+00 : f32
      %54 = vector.broadcast %cst_23 : f32 to vector<128x1xf32>
      %55 = arith.select %53, %41, %54 : vector<128x1xi1>, vector<128x1xf32>
      %c0_24 = arith.constant 0 : index
      %c0_25 = arith.constant 0 : index
      %56 = vector.load %arg4[%c0_24, %c0_25] : memref<128x1xf32, #tpu.memory_space<vmem>>, vector<128x1xf32>
      tpu.vector_store %arg4[%c0_24, %c0_25], %55 {strides = array<i32>} : memref<128x1xf32, #tpu.memory_space<vmem>>, vector<128x1xf32>,
    } else {
    }
    return
  }
  func.func @transform_0(%arg0: i32, %arg1: i32) -> (i32, i32) {
    %c0_i32 = arith.constant 0 : i32
    %c0_i32_0 = arith.constant 0 : i32
    return %arg0, %c0_i32 : i32, i32
  }
  func.func @transform_1(%arg0: i32, %arg1: i32) -> (i32, i32) {
    %c0_i32 = arith.constant 0 : i32
    %c0_i32_0 = arith.constant 0 : i32
    return %arg1, %c0_i32 : i32, i32
  }
  func.func @transform_2(%arg0: i32, %arg1: i32) -> (i32, i32) {
    %c0_i32 = arith.constant 0 : i32
    %c0_i32_0 = arith.constant 0 : i32
    return %arg0, %c0_i32 : i32, i32
  }
}

</mosaic_0001>

<bundles_post_ra>
// kernel: tpu_custom_call.1
= control target key start
LH: loop header
LB: loop body
LE: loop exit
PB: predicated region body
PF: predicated region fallthrough
CT: control target
= control target key end

     0   :  { %s1631_s9 = smov 0   ;;  %s1633_s10 = smov 0   ;;  %s2460_s0 = inlined_call_operand.vmem [shape: f32[256,32], index: 0, kind: input, shape index: {}]   ;;  %s2461_s1 = inlined_call_operand.vmem [shape: f32[256,32], index: 1, kind: input, shape index: {}]   ;;  %s2462_s2 = inlined_call_operand.vmem [shape: f32[256,1], index: 2, kind: output, shape index: {}]  }
   0x1   :  { %s1635_s11 = smov 0   ;;  %s1637_s12 = smov 0  }
   0x2   :  { %s1639_s13 = smov 0  }
   0x3 LB: > { %s21_s14 = sadd.s32 1, %s1605_s11  ;;  %s24_s15 = sadd.s32 1, %s1609_s12  ;;  %s1613_s13 = sphi %s1639_s13, %s12_s13   ;;  %s1609_s12 = sphi %s1637_s12, %s2523_s12   ;;  %s1605_s11 = sphi %s1635_s11, %s2522_s11   ;;  %s1601_s10 = sphi %s1633_s10, %s2521_s10   ;;  %s1597_s9 = sphi %s1631_s9, %s2520_s9  }
   0x4   : > { %p22_p0 = scmp.ge.s32.totalorder %s21_s14, 2  ;;  %p1252_p1 = scmp.ge.s32.totalorder %s1613_s13, 1 }
   0x5   : > { %p136_p2 = scmp.lt.s32.totalorder %s1613_s13, 5 }
   0x6   : > { %s2525_s14 = smov (%p22_p0, %s21_s14), 0  ;;  %s2527_s15 = smov (!%p22_p0, %s24_s15), %s1609_s12 }
   0x7   : > { %p137_p3 = pnand %p1252_p1, %p136_p2  ;;  %p26_p4 = scmp.ge.s32.totalorder %s2527_s15, 2 }
   0x8   : > { %s1253_s16 = sshll.u32 (!%p137_p3), %s1601_s10, 4  ;;  %s1255_s17 = sshll.u32 (!%p137_p3), %s1597_s9, 4 }
   0x9   : > { %s2529_s15 = smov (%p26_p4, %s2527_s15), 0  ;;  %140 = sbr.rel (%p137_p3) target bundleno = 900 (0x384), region = 28 }
   0xa   : > { %p164_p5 = scmp.lt.s32.totalorder (!%p137_p3), %s1253_s16, 31  ;;  %p170_p6 = scmp.lt.s32.totalorder (!%p137_p3), %s1255_s17, 31 }
   0xb   : > { %p181_p7 = scmp.eq.s32.totalorder (!%p137_p3), %s1597_s9, 0  ;;  %p1259_p8 = scmp.ne.s32.totalorder (!%p137_p3), %s1597_s9, 0 }
  0x10   : > { %s2531_s16 = smov (!%p164_p5, %s1253_s16), 31  ;;  %s2533_s17 = smov (!%p170_p6, %s1255_s17), 31 }
  0x11   : > { %s1254_s18 = sshll.u32 %s2531_s16, 3  ;;  %s1256_s22 = sshll.u32 %s2533_s17, 3  ;;  %vm185_vm0 = vcmask (!%p1259_p8), 7168   ;;  %v1615_v0 = vmov (!%p1259_p8), 0.0  }
  0x12   : > { %s1671_s21 = scalar_lea.vmem %s2460_s0, %s1254_s18  ;;  %s1676_s25 = scalar_lea.vmem %s2461_s1, %s1256_s22  ;;  %186 = vst.msk [vmem:[#allocation3] sm:$0xff] (!%p1259_p8), %vm185_vm0, %v1615_v0  ;;  %187 = vst.msk [vmem:[#allocation3 + $0x8] sm:$0xff] (!%p1259_p8), %vm185_vm0, %v1615_v0 }
  0x13   : > { %s1681_s28 = scalar_lea.vmem %s2462_s2, %s1254_s18  ;;  %184 = sbr.rel (%p1259_p8) target bundleno = 26 (0x1a), region = 32  ;;  %188 = vst.msk [vmem:[#allocation3 + $0x10] sm:$0xff] (!%p1259_p8), %vm185_vm0, %v1615_v0  ;;  %189 = vst.msk [vmem:[#allocation3 + $0x18] sm:$0xff] (!%p1259_p8), %vm185_vm0, %v1615_v0 }
  0x14   : > { %190 = vst.msk [vmem:[#allocation3 + $0x20] sm:$0xff] (!%p1259_p8), %vm185_vm0, %v1615_v0  ;;  %191 = vst.msk [vmem:[#allocation3 + $0x28] sm:$0xff] (!%p1259_p8), %vm185_vm0, %v1615_v0 }
  0x15   : > { %192 = vst.msk [vmem:[#allocation3 + $0x30] sm:$0xff] (!%p1259_p8), %vm185_vm0, %v1615_v0  ;;  %193 = vst.msk [vmem:[#allocation3 + $0x38] sm:$0xff] (!%p1259_p8), %vm185_vm0, %v1615_v0 }
  0x16   : > { %194 = vst.msk [vmem:[#allocation3 + $0x40] sm:$0xff] (!%p1259_p8), %vm185_vm0, %v1615_v0  ;;  %195 = vst.msk [vmem:[#allocation3 + $0x48] sm:$0xff] (!%p1259_p8), %vm185_vm0, %v1615_v0 }
  0x17   : > { %196 = vst.msk [vmem:[#allocation3 + $0x50] sm:$0xff] (!%p1259_p8), %vm185_vm0, %v1615_v0  ;;  %197 = vst.msk [vmem:[#allocation3 + $0x58] sm:$0xff] (!%p1259_p8), %vm185_vm0, %v1615_v0 }
  0x18   : > { %198 = vst.msk [vmem:[#allocation3 + $0x60] sm:$0xff] (!%p1259_p8), %vm185_vm0, %v1615_v0  ;;  %199 = vst.msk [vmem:[#allocation3 + $0x68] sm:$0xff] (!%p1259_p8), %vm185_vm0, %v1615_v0 }
  0x19   : > { %200 = vst.msk [vmem:[#allocation3 + $0x70] sm:$0xff] (!%p1259_p8), %vm185_vm0, %v1615_v0  ;;  %201 = vst.msk [vmem:[#allocation3 + $0x78] sm:$0xff] (!%p1259_p8), %vm185_vm0, %v1615_v0 }
  0x1a PF: > { %v218_v1 = vld [vmem:[%s1676_s25] sm:$0xff]  ;;  %v219_v2 = vld [vmem:[%s1676_s25 + $0x8] sm:$0xff]  ;;  %vm234_vm1 = vcmask 261120   ;;  %v220_v3 = vld [vmem:[%s1676_s25 + $0x10] sm:$0xff]  ;;  %s476_s29 = sadd.s32 1, %s1601_s10 }
  0x1b   : > { %v1406_v4 = vpack.c.bf16 %v219_v2, %v218_v1  ;;  %vm1705_vm2 = vmpackc.low %vm234_vm1, %vm234_vm1  ;;  %v221_v6 = vld [vmem:[%s1676_s25 + $0x18] sm:$0xff]  ;;  %v202_v8 = vld [vmem:[%s1671_s21] sm:$0xff]  ;;  %s478_s30 = ssub.s32 0, %s476_s29  ;;  %p477_p9 = scmp.lt.s32.totalorder %s476_s29, 0 }
  0x1c   : > { %v1412_v7 = vpack.c.bf16 %v221_v6, %v220_v3  ;;  %v222_v9 = vld [vmem:[%s1676_s25 + $0x20] sm:$0xff]  ;;  %v223_v10 = vld [vmem:[%s1676_s25 + $0x28] sm:$0xff]  ;;  %1382 = vmatprep.mubr.msk.f32.mxu0 %vm234_vm1, %v202_v8  ;;  %v224_v13 = vld [vmem:[%s1676_s25 + $0x30] sm:$0xff]  ;;  %s1292_s3 = smin.u32 %s478_s30, %s476_s29 }
  0x1d   : > { %1408 = vmatprep.subr.msk.bf16.mxu0 %vm1705_vm2, %v1406_v4  ;;  %1454 = vmatprep.subr.msk.bf16.mxu1 %vm1705_vm2, %v1406_v4  ;;  %v210_v11 = vld [vmem:[%s1671_s21 + $0x40] sm:$0xff]  ;;  %v1418_v12 = vpack.c.bf16 %v223_v10, %v222_v9  ;;  %v225_v14 = vld [vmem:[%s1676_s25 + $0x38] sm:$0xff]  ;;  %v227_v17 = vld [vmem:[%s1676_s25 + $0x48] sm:$0xff]  ;;  %s480_s4 = sand.u32 1, %s1292_s3  }
  0x1e   : > { %1411 = vmatpush3.bf16.xpose.msk.msra.mxu0 %vm1705_vm2, %v1406_v4  ;;  %1462 = vmatpush3.bf16.xpose.msk.msra.mxu1 %vm1705_vm2, %v1406_v4  ;;  %v1424_v15 = vpack.c.bf16 %v225_v14, %v224_v13  ;;  %v226_v16 = vld [vmem:[%s1676_s25 + $0x40] sm:$0xff]  ;;  %v228_v19 = vld [vmem:[%s1676_s25 + $0x50] sm:$0xff]  ;;  %v229_v20 = vld [vmem:[%s1676_s25 + $0x58] sm:$0xff]  ;;  %s481_s5 = ssub.s32 0, %s480_s4 }
  0x1f   : > { %1414 = vmatprep.subr.msk.bf16.mxu0 %vm1705_vm2, %v1412_v7  ;;  %1455 = vmatprep.subr.msk.bf16.mxu1 %vm1705_vm2, %v1412_v7  ;;  %v1430_v18 = vpack.c.bf16 %v227_v17, %v226_v16  ;;  %v1436_v21 = vpack.c.bf16 %v229_v20, %v228_v19  ;;  %v230_v22 = vld [vmem:[%s1676_s25 + $0x60] sm:$0xff]  ;;  %v231_v23 = vld [vmem:[%s1676_s25 + $0x68] sm:$0xff]  ;;  %v232_v25 = vld [vmem:[%s1676_s25 + $0x70] sm:$0xff]  ;;  %s2535_s5 = smov (!%p477_p9, %s481_s5), %s480_s4 }
  0x20   : > { %1394 = vmatprep.mubr.msk.f32.mxu1 %vm234_vm1, %v210_v11  ;;  %v1442_v24 = vpack.c.bf16 %v231_v23, %v230_v22  ;;  %v233_v26 = vld [vmem:[%s1676_s25 + $0x78] sm:$0xff]  ;;  %v203_v28 = vld [vmem:[%s1671_s21 + $0x8] sm:$0xff]  ;;  %v204_v30 = vld [vmem:[%s1671_s21 + $0x10] sm:$0xff]  ;;  %p1294_p10 = scmp.lt.s32.totalorder %s2535_s5, 0  ;;  %s487_s6 = sadd.s32 2, %s2535_s5 }
  0x21   : > { %v1448_v27 = vpack.c.bf16 %v233_v26, %v232_v25  ;;  %v211_v29 = vld [vmem:[%s1671_s21 + $0x48] sm:$0xff]  ;;  %v212_v31 = vld [vmem:[%s1671_s21 + $0x50] sm:$0xff]  ;;  %v205_v32 = vld [vmem:[%s1671_s21 + $0x18] sm:$0xff] }
  0x22   : > { %v213_v33 = vld [vmem:[%s1671_s21 + $0x58] sm:$0xff]  ;;  %v206_v34 = vld [vmem:[%s1671_s21 + $0x20] sm:$0xff]  ;;  %v207_v36 = vld [vmem:[%s1671_s21 + $0x28] sm:$0xff]  ;;  %s2537_s6 = smov (!%p1294_p10, %s487_s6), %s2535_s5 }
  0x23   : > { %v214_v35 = vld [vmem:[%s1671_s21 + $0x60] sm:$0xff]  ;;  %v215_v37 = vld [vmem:[%s1671_s21 + $0x68] sm:$0xff]  ;;  %v208_v38 = vld [vmem:[%s1671_s21 + $0x30] sm:$0xff]  ;;  %p1295_p11 = scmp.ne.s32.totalorder %s1597_s9, %s2537_s6 }
  0x24   : > { %v216_v39 = vld [vmem:[%s1671_s21 + $0x70] sm:$0xff]  ;;  %v209_v40 = vld [vmem:[%s1671_s21 + $0x38] sm:$0xff]  ;;  %v493_v58 = vlaneseq (!%p1295_p11) }
  0x25   : > { %v217_v41 = vld [vmem:[%s1671_s21 + $0x78] sm:$0xff] }
  0x26   : > { %1417 = vmatpush3.bf16.xpose.msk.msra.mxu0 %vm1705_vm2, %v1412_v7  ;;  %1463 = vmatpush3.bf16.xpose.msk.msra.mxu1 %vm1705_vm2, %v1412_v7  ;;  %v494_v59 = vshrl.u32 (!%p1295_p11), %v493_v58, 7  ;;  %v511_v60 = vand.u32 (!%p1295_p11), 127, %v493_v58 }
  0x27   : > { %1420 = vmatprep.subr.msk.bf16.mxu0 %vm1705_vm2, %v1418_v12  ;;  %1456 = vmatprep.subr.msk.bf16.mxu1 %vm1705_vm2, %v1418_v12 }
  0x28   : > { %vm512_vm3 = vcmp.eq.s32.totalorder (!%p1295_p11), %v494_v59, %v511_v60  ;;  %v496_v61 = vadd.s32 (!%p1295_p11), 16, %v494_v59  ;;  %v497_v62 = vadd.s32 (!%p1295_p11), 24, %v494_v59  ;;  %v495_v63 = vadd.s32 (!%p1295_p11), 8, %v494_v59 }
  0x29   : > { %v498_v1 = vadd.s32 (!%p1295_p11), 32, %v494_v59  ;;  %v499_v2 = vadd.s32 (!%p1295_p11), 40, %v494_v59  ;;  %v500_v5 = vadd.s32 (!%p1295_p11), 48, %v494_v59  ;;  %v501_v7 = vadd.s32 (!%p1295_p11), 56, %v494_v59 }
  0x2a   : > { %vm514_vm4 = vcmp.eq.s32.totalorder (!%p1295_p11), %v496_v61, %v511_v60  ;;  %vm515_vm5 = vcmp.eq.s32.totalorder (!%p1295_p11), %v497_v62, %v511_v60  ;;  %vm513_vm6 = vcmp.eq.s32.totalorder (!%p1295_p11), %v495_v63, %v511_v60  ;;  %v502_v9 = vadd.s32 (!%p1295_p11), 64, %v494_v59 }
  0x2b   : > { %vm516_vm7 = vcmp.eq.s32.totalorder (!%p1295_p11), %v498_v1, %v511_v60  ;;  %vm517_vm8 = vcmp.eq.s32.totalorder (!%p1295_p11), %v499_v2, %v511_v60  ;;  %vm518_vm9 = vcmp.eq.s32.totalorder (!%p1295_p11), %v500_v5, %v511_v60  ;;  %vm519_vm10 = vcmp.eq.s32.totalorder (!%p1295_p11), %v501_v7, %v511_v60 }
  0x2c   : > { %v503_v11 = vadd.s32 (!%p1295_p11), 72, %v494_v59  ;;  %vm520_vm11 = vcmp.eq.s32.totalorder (!%p1295_p11), %v502_v9, %v511_v60  ;;  %v504_v13 = vadd.s32 (!%p1295_p11), 80, %v494_v59  ;;  %v506_v17 = vadd.s32 (!%p1295_p11), 96, %v494_v59 }
  0x2d   : > { %v507_v19 = vadd.s32 (!%p1295_p11), 104, %v494_v59  ;;  %v509_v23 = vadd.s32 (!%p1295_p11), 120, %v494_v59 }
  0x2e   : > { %1423 = vmatpush3.bf16.xpose.msk.msra.mxu0 %vm1705_vm2, %v1418_v12  ;;  %1464 = vmatpush3.bf16.xpose.msk.msra.mxu1 %vm1705_vm2, %v1418_v12  ;;  %vm521_vm12 = vcmp.eq.s32.totalorder (!%p1295_p11), %v503_v11, %v511_v60  ;;  %vm522_vm13 = vcmp.eq.s32.totalorder (!%p1295_p11), %v504_v13, %v511_v60  ;;  %vm524_vm15 = vcmp.eq.s32.totalorder (!%p1295_p11), %v506_v17, %v511_v60 }
  0x2f   : > { %1426 = vmatprep.subr.msk.bf16.mxu0 %vm1705_vm2, %v1424_v15  ;;  %1457 = vmatprep.subr.msk.bf16.mxu1 %vm1705_vm2, %v1424_v15  ;;  %vm525_vm0 = vcmp.eq.s32.totalorder (!%p1295_p11), %v507_v19, %v511_v60 }
  0x36   : > { %1429 = vmatpush3.bf16.xpose.msk.msra.mxu0 %vm1705_vm2, %v1424_v15  ;;  %1465 = vmatpush3.bf16.xpose.msk.msra.mxu1 %vm1705_vm2, %v1424_v15  ;;  %v505_v15 = vadd.s32 (!%p1295_p11), 88, %v494_v59 }
  0x37   : > { %1432 = vmatprep.subr.msk.bf16.mxu0 %vm1705_vm2, %v1430_v18  ;;  %1458 = vmatprep.subr.msk.bf16.mxu1 %vm1705_vm2, %v1430_v18 }
  0x38   : > { %vm523_vm14 = vcmp.eq.s32.totalorder (!%p1295_p11), %v505_v15, %v511_v60 }
  0x3e   : > { %1435 = vmatpush3.bf16.xpose.msk.msra.mxu0 %vm1705_vm2, %v1430_v18  ;;  %1466 = vmatpush3.bf16.xpose.msk.msra.mxu1 %vm1705_vm2, %v1430_v18 }
  0x3f   : > { %1438 = vmatprep.subr.msk.bf16.mxu0 %vm1705_vm2, %v1436_v21  ;;  %1459 = vmatprep.subr.msk.bf16.mxu1 %vm1705_vm2, %v1436_v21 }
  0x46   : > { %1441 = vmatpush3.bf16.xpose.msk.msra.mxu0 %vm1705_vm2, %v1436_v21  ;;  %1467 = vmatpush3.bf16.xpose.msk.msra.mxu1 %vm1705_vm2, %v1436_v21  ;;  %v508_v21 = vadd.s32 (!%p1295_p11), 112, %v494_v59 }
  0x47   : > { %1444 = vmatprep.subr.msk.bf16.mxu0 %vm1705_vm2, %v1442_v24  ;;  %1460 = vmatprep.subr.msk.bf16.mxu1 %vm1705_vm2, %v1442_v24 }
  0x4e   : > { %1447 = vmatpush3.bf16.xpose.msk.msra.mxu0 %vm1705_vm2, %v1442_v24  ;;  %1468 = vmatpush3.bf16.xpose.msk.msra.mxu1 %vm1705_vm2, %v1442_v24 }
  0x4f   : > { %1450 = vmatprep.subr.msk.bf16.mxu0 %vm1705_vm2, %v1448_v27  ;;  %1461 = vmatprep.subr.msk.bf16.mxu1 %vm1705_vm2, %v1448_v27 }
  0x56   : > { %1453 = vmatpush3.bf16.xpose.msk.msra.mxu0 %vm1705_vm2, %v1448_v27  ;;  %1469 = vmatpush3.bf16.xpose.msk.msra.mxu1 %vm1705_vm2, %v1448_v27  ;;  %vm527_vm2 = vcmp.eq.s32.totalorder (!%p1295_p11), %v509_v23, %v511_v60 }
  0x5d   : > { %1383 = vmatmul.mubr.msk.f32.vlgmr.msra.gmra.mrb[0].mxu0 %vm234_vm1, %v203_v28  ;;  %1395 = vmatmul.mubr.msk.f32.vlgmr.msra.gmra.mrb[0].mxu1 %vm234_vm1, %v211_v29 }
  0x5e   : > { %1385 = vmatprep.mubr.msk.f32.mxu0 %vm234_vm1, %v204_v30  ;;  %1397 = vmatprep.mubr.msk.f32.mxu1 %vm234_vm1, %v212_v31 }
  0x61   : > { %1386 = vmatmul.mubr.msk.f32.gmra.mrb[2].mxu0 %vm234_vm1, %v205_v32  ;;  %1398 = vmatmul.mubr.msk.f32.gmra.mrb[2].mxu1 %vm234_vm1, %v213_v33 }
  0x62   : > { %1388 = vmatprep.mubr.msk.f32.mxu0 %vm234_vm1, %v206_v34  ;;  %1400 = vmatprep.mubr.msk.f32.mxu1 %vm234_vm1, %v214_v35 }
  0x65   : > { %1389 = vmatmul.mubr.msk.f32.gmra.mrb[4].mxu0 %vm234_vm1, %v207_v36  ;;  %1401 = vmatmul.mubr.msk.f32.gmra.mrb[4].mxu1 %vm234_vm1, %v215_v37 }
  0x66   : > { %1391 = vmatprep.mubr.msk.f32.mxu0 %vm234_vm1, %v208_v38  ;;  %1403 = vmatprep.mubr.msk.f32.mxu1 %vm234_vm1, %v216_v39 }
  0x69   : > { %1392 = vmatmul.mubr.msk.f32.gmra.mrb[6].mxu0 %vm234_vm1, %v209_v40  ;;  %1404 = vmatmul.mubr.msk.f32.gmra.mrb[6].mxu1 %vm234_vm1, %v217_v41  ;;  %vm526_vm1 = vcmp.eq.s32.totalorder (!%p1295_p11), %v508_v21, %v511_v60 }
 0x130   : > { %v1819_v42 = vpop.f32.mrb[0].mxu0  ;;  %v1821_v43 = vpop.f32.mrb[0].mxu1 }
 0x131   : > { %v1823_v44 = vpop.f32.mrb[1].mxu0  ;;  %v1825_v45 = vpop.f32.mrb[1].mxu1  ;;  %v529_v4 = vsel (!%p1295_p11), %vm513_vm6, %v1819_v42, 0.0  ;;  %v537_v18 = vsel (!%p1295_p11), %vm521_vm12, %v1821_v43, 0.0 }
 0x132   : > { %v528_v0 = vsel (!%p1295_p11), %vm512_vm3, %v1823_v44, 0.0  ;;  %v536_v16 = vsel (!%p1295_p11), %vm520_vm11, %v1825_v45, 0.0  ;;  %vm576_vm3 = vcmask (!%p1295_p11), 7168  }
 0x133   : > { %544 = vadd.xlane.f32.xlu0 (!%p1295_p11), %v528_v0 }
 0x134   : > { %v1827_v46 = vpop.f32.mrb[2].mxu0  ;;  %v1829_v47 = vpop.f32.mrb[2].mxu1 }
 0x135   : > { %v1831_v48 = vpop.f32.mrb[3].mxu0  ;;  %v1833_v49 = vpop.f32.mrb[3].mxu1  ;;  %v531_v6 = vsel (!%p1295_p11), %vm515_vm5, %v1827_v46, 0.0  ;;  %v539_v22 = vsel (!%p1295_p11), %vm523_vm14, %v1829_v47, 0.0 }
 0x136   : > { %v530_v3 = vsel (!%p1295_p11), %vm514_vm4, %v1831_v48, 0.0  ;;  %v538_v20 = vsel (!%p1295_p11), %vm522_vm13, %v1833_v49, 0.0 }
 0x137   : > { %492 = sbr.rel (%p1295_p11) target bundleno = 482 (0x1e2), region = 36  ;;  %548 = vadd.xlane.f32.xlu1 (!%p1295_p11), %v530_v3  ;;  %546 = vadd.xlane.f32.xlu0 (!%p1295_p11), %v529_v4 }
 0x138   : > { %v1835_v50 = vpop.f32.mrb[4].mxu0  ;;  %v1837_v51 = vpop.f32.mrb[4].mxu1 }
 0x139   : > { %v1839_v52 = vpop.f32.mrb[5].mxu0  ;;  %v1841_v53 = vpop.f32.mrb[5].mxu1  ;;  %v533_v10 = vsel (!%p1295_p11), %vm517_vm8, %v1835_v50, 0.0  ;;  %v541_v25 = vsel (!%p1295_p11), %vm525_vm0, %v1837_v51, 0.0 }
 0x13a   : > { %v532_v8 = vsel (!%p1295_p11), %vm516_vm7, %v1839_v52, 0.0  ;;  %v540_v24 = vsel (!%p1295_p11), %vm524_vm15, %v1841_v53, 0.0 }
 0x13b   : > { %550 = vadd.xlane.f32.xlu1 (!%p1295_p11), %v531_v6  ;;  %552 = vadd.xlane.f32.xlu0 (!%p1295_p11), %v532_v8 }
 0x13c   : > { %v1843_v54 = vpop.f32.mrb[6].mxu0  ;;  %v1845_v55 = vpop.f32.mrb[6].mxu1 }
 0x13d   : > { %v1847_v56 = vpop.f32.mrb[7].mxu0  ;;  %v1849_v57 = vpop.f32.mrb[7].mxu1  ;;  %v535_v14 = vsel (!%p1295_p11), %vm519_vm10, %v1843_v54, 0.0  ;;  %v543_v27 = vsel (!%p1295_p11), %vm527_vm2, %v1845_v55, 0.0 }
 0x13e   : > { %v534_v12 = vsel %vm518_vm9, %v1847_v56, 0.0  ;;  %v542_v26 = vsel %vm526_vm1, %v1849_v57, 0.0 }
 0x13f   : > { %554 = vadd.xlane.f32.xlu1 %v533_v10  ;;  %556 = vadd.xlane.f32.xlu0 %v534_v12 }
 0x143   : > { %558 = vadd.xlane.f32.xlu1 %v535_v14  ;;  %560 = vadd.xlane.f32.xlu0 %v536_v16 }
 0x147   : > { %562 = vadd.xlane.f32.xlu1 %v537_v18  ;;  %564 = vadd.xlane.f32.xlu0 %v538_v20 }
 0x14b   : > { %566 = vadd.xlane.f32.xlu1 %v539_v22  ;;  %568 = vadd.xlane.f32.xlu0 %v540_v24 }
 0x14f   : > { %570 = vadd.xlane.f32.xlu1 %v541_v25  ;;  %572 = vadd.xlane.f32.xlu0 %v542_v26 }
 0x153   : > { %574 = vadd.xlane.f32.xlu1 %v543_v27 }
 0x1c0   : > { %v545_v28 = vpop.xlane.xlu0 %544 }
 0x1c1   : > { %577 = vst.msk [vmem:[#allocation4] sm:$0xff] %vm576_vm3, %v545_v28 }
 0x1c4   : > { %v549_v29 = vpop.xlane.xlu1 %548  ;;  %v547_v30 = vpop.xlane.xlu0 %546 }
 0x1c5   : > { %579 = vst.msk [vmem:[#allocation4 + $0x10] sm:$0xff] %vm576_vm3, %v549_v29  ;;  %578 = vst.msk [vmem:[#allocation4 + $0x8] sm:$0xff] %vm576_vm3, %v547_v30 }
 0x1c8   : > { %v551_v31 = vpop.xlane.xlu1 %550  ;;  %v553_v32 = vpop.xlane.xlu0 %552 }
 0x1c9   : > { %580 = vst.msk [vmem:[#allocation4 + $0x18] sm:$0xff] %vm576_vm3, %v551_v31  ;;  %581 = vst.msk [vmem:[#allocation4 + $0x20] sm:$0xff] %vm576_vm3, %v553_v32 }
 0x1cc   : > { %v555_v33 = vpop.xlane.xlu1 %554  ;;  %v557_v34 = vpop.xlane.xlu0 %556 }
 0x1cd   : > { %582 = vst.msk [vmem:[#allocation4 + $0x28] sm:$0xff] %vm576_vm3, %v555_v33  ;;  %583 = vst.msk [vmem:[#allocation4 + $0x30] sm:$0xff] %vm576_vm3, %v557_v34 }
 0x1d0   : > { %v559_v35 = vpop.xlane.xlu1 %558  ;;  %v561_v36 = vpop.xlane.xlu0 %560 }
 0x1d1   : > { %584 = vst.msk [vmem:[#allocation4 + $0x38] sm:$0xff] %vm576_vm3, %v559_v35  ;;  %585 = vst.msk [vmem:[#allocation4 + $0x40] sm:$0xff] %vm576_vm3, %v561_v36 }
 0x1d4   : > { %v563_v37 = vpop.xlane.xlu1 %562  ;;  %v565_v38 = vpop.xlane.xlu0 %564 }
 0x1d5   : > { %586 = vst.msk [vmem:[#allocation4 + $0x48] sm:$0xff] %vm576_vm3, %v563_v37  ;;  %587 = vst.msk [vmem:[#allocation4 + $0x50] sm:$0xff] %vm576_vm3, %v565_v38 }
 0x1d8   : > { %v567_v39 = vpop.xlane.xlu1 %566  ;;  %v569_v40 = vpop.xlane.xlu0 %568 }
 0x1d9   : > { %588 = vst.msk [vmem:[#allocation4 + $0x58] sm:$0xff] %vm576_vm3, %v567_v39  ;;  %589 = vst.msk [vmem:[#allocation4 + $0x60] sm:$0xff] %vm576_vm3, %v569_v40 }
 0x1dc   : > { %v571_v41 = vpop.xlane.xlu1 %570  ;;  %v573_v58 = vpop.xlane.xlu0 %572 }
 0x1dd   : > { %590 = vst.msk [vmem:[#allocation4 + $0x68] sm:$0xff] %vm576_vm3, %v571_v41  ;;  %591 = vst.msk [vmem:[#allocation4 + $0x70] sm:$0xff] %vm576_vm3, %v573_v58 }
 0x1e0   : > { %v575_v59 = vpop.xlane.xlu1 %574 }
 0x1e1   : > { %592 = vst.msk [vmem:[#allocation4 + $0x78] sm:$0xff] %vm576_vm3, %v575_v59 }
 0x1e2 PF: > { %p593_p12 = scmp.eq.s32.totalorder %s1597_s9, %s1601_s10  ;;  %p595_p13 = scmp.eq.s32.totalorder %s1597_s9, 1  ;;  %v1296_v60 = vadd.f32 -2.0, %v1823_v44  ;;  %v1297_v61 = vadd.f32 -2.0, %v1819_v42  ;;  %v1298_v62 = vadd.f32 -2.0, %v1831_v48  ;;  %v1299_v63 = vadd.f32 -2.0, %v1827_v46 }
 0x1e3   : > { %v1300_v0 = vadd.f32 -2.0, %v1839_v52  ;;  %v1301_v1 = vadd.f32 -2.0, %v1835_v50  ;;  %v1302_v2 = vadd.f32 -2.0, %v1847_v56  ;;  %v1303_v42 = vadd.f32 -2.0, %v1843_v54 }
 0x1e4   : > { %p594_p0 = por %p593_p12, %p181_p7  ;;  %v613_v3 = vmul.f32 1.442695, %v1296_v60  ;;  %v615_v44 = vmul.f32 1.442695, %v1297_v61  ;;  %v617_v4 = vmul.f32 1.442695, %v1298_v62 }
 0x1e5   : > { %v619_v48 = vmul.f32 1.442695, %v1299_v63  ;;  %v1304_v46 = vadd.f32 -2.0, %v1825_v45  ;;  %v621_v5 = vmul.f32 1.442695, %v1300_v0  ;;  %v1305_v52 = vadd.f32 -2.0, %v1821_v43 }
 0x1e6   : > { %p1896_p1 = por %p595_p13, %p594_p0  ;;  %1511 = vpow2.f32 %v613_v3  ;;  %v623_v50 = vmul.f32 1.442695, %v1301_v1  ;;  %v1306_v56 = vadd.f32 -2.0, %v1833_v49  ;;  %v625_v6 = vmul.f32 1.442695, %v1302_v2 }
 0x1e7   : > { %1513 = vpow2.f32 %v615_v44  ;;  %v1307_v7 = vadd.f32 -2.0, %v1829_v47  ;;  %v627_v8 = vmul.f32 1.442695, %v1303_v42  ;;  %v1308_v9 = vadd.f32 -2.0, %v1841_v53  ;;  %s1312_s8 = sshll.u32 (%p1896_p1), %s1601_s10, 7  ;;  %s1313_s16 = sshll.u32 (%p1896_p1), %s1597_s9, 7 }
 0x1e8   : > { %1515 = vpow2.f32 %v617_v4  ;;  %v629_v54 = vmul.f32 1.442695, %v1304_v46  ;;  %v1309_v45 = vadd.f32 -2.0, %v1837_v51  ;;  %v631_v10 = vmul.f32 1.442695, %v1305_v52 }
 0x1e9   : > { %1517 = vpow2.f32 %v619_v48  ;;  %v1310_v43 = vadd.f32 -2.0, %v1849_v57  ;;  %v633_v11 = vmul.f32 1.442695, %v1306_v56  ;;  %v1311_v49 = vadd.f32 -2.0, %v1845_v55 }
 0x1ea   : > { %1519 = vpow2.f32 %v621_v5  ;;  %v635_v12 = vmul.f32 1.442695, %v1307_v7  ;;  %v637_v47 = vmul.f32 1.442695, %v1308_v9  ;;  %v639_v13 = vmul.f32 1.442695, %v1309_v45 }
 0x1eb   : > { %1521 = vpow2.f32 %v623_v50  ;;  %v641_v53 = vmul.f32 1.442695, %v1310_v43  ;;  %v643_v51 = vmul.f32 1.442695, %v1311_v49  ;;  %v649_v28 = vlaneseq (%p1896_p1) }
 0x1ec   : > { %1523 = vpow2.f32 %v625_v6  ;;  %v1945_v29 = vstv (%p1896_p1), %s1312_s8  ;;  %v686_v30 = vstv (%p1896_p1), %s1313_s16 }
 0x1ed   : > { %1525 = vpow2.f32 %v627_v8  ;;  %v1947_v31 = vshrl.u32 (%p1896_p1), %v649_v28, 7  ;;  %v685_v32 = vand.u32 (%p1896_p1), 127, %v649_v28 }
 0x1ee   : > { %1527 = vpow2.f32 %v629_v54 }
 0x1ef   : > { %1529 = vpow2.f32 %v631_v10  ;;  %v652_v33 = vadd.s32 (%p1896_p1), 16, %v1947_v31  ;;  %v1950_v34 = vadd.s32 (%p1896_p1), %v686_v30, %v685_v32  ;;  %v667_v35 = vadd.s32 (%p1896_p1), %v1945_v29, %v1947_v31 }
 0x1f0   : > { %v1909_v14 = vpop.eup %1511  ;;  %1531 = vpow2.f32 %v633_v11  ;;  %v653_v36 = vadd.s32 (%p1896_p1), 24, %v1947_v31  ;;  %v651_v37 = vadd.s32 (%p1896_p1), 8, %v1947_v31  ;;  %v655_v38 = vadd.s32 (%p1896_p1), 40, %v1947_v31 }
 0x1f1   : > { %v1911_v15 = vpop.eup %1513  ;;  %1533 = vpow2.f32 %v635_v12  ;;  %v669_v39 = vadd.s32 (%p1896_p1), %v1945_v29, %v652_v33  ;;  %vm704_vm4 = vcmp.ge.s32.totalorder (%p1896_p1), %v1950_v34, 4  ;;  %vm705_vm5 = vcmp.lt.s32.totalorder (%p1896_p1), %v1950_v34, 128 }
 0x1f2   : > { %v1913_v16 = vpop.eup %1515  ;;  %1535 = vpow2.f32 %v637_v47  ;;  %v654_v40 = vadd.s32 (%p1896_p1), 32, %v1947_v31  ;;  %vm1961_vm6 = vmand (%p1896_p1), %vm704_vm4, %vm705_vm5  ;;  %vm723_vm7 = vcmp.ge.s32.totalorder (%p1896_p1), %v1950_v34, 132  ;;  %vm688_vm8 = vcmp.eq.s32.totalorder (%p1896_p1), %v667_v35, %v1950_v34  ;;  %v758_v35 = vld [vmem:[#allocation3 + $0x10] sm:$0xff] (%p1896_p1) }
 0x1f3   : > { %v1915_v57 = vpop.eup %1517  ;;  %1537 = vpow2.f32 %v639_v13  ;;  %v670_v58 = vadd.s32 (%p1896_p1), %v1945_v29, %v653_v36  ;;  %v668_v59 = vadd.s32 (%p1896_p1), %v1945_v29, %v651_v37  ;;  %vm690_vm9 = vcmp.eq.s32.totalorder (%p1896_p1), %v669_v39, %v1950_v34  ;;  %vm707_vm10 = vmor (%p1896_p1), %vm688_vm8, %vm1961_vm6  ;;  %v756_v36 = vld [vmem:[#allocation3] sm:$0xff] (%p1896_p1) }
 0x1f4   : > { %v1917_v55 = vpop.eup %1519  ;;  %1539 = vpow2.f32 %v641_v53  ;;  %vm709_vm11 = vmor (%p1896_p1), %vm690_vm9, %vm1961_vm6  ;;  %v672_v60 = vadd.s32 (%p1896_p1), %v1945_v29, %v655_v38  ;;  %v657_v61 = vadd.s32 (%p1896_p1), 56, %v1947_v31  ;;  %v671_v63 = vadd.s32 (%p1896_p1), %v1945_v29, %v654_v40 }
 0x1f5   : > { %v1919_v17 = vpop.eup %1521  ;;  %1541 = vpow2.f32 %v643_v51  ;;  %vm691_vm12 = vcmp.eq.s32.totalorder (%p1896_p1), %v670_v58, %v1950_v34  ;;  %vm726_vm13 = vmor (%p1896_p1), %vm709_vm11, %vm723_vm7  ;;  %vm689_vm15 = vcmp.eq.s32.totalorder (%p1896_p1), %v668_v59, %v1950_v34  ;;  %v656_v0 = vadd.s32 (%p1896_p1), 48, %v1947_v31  ;;  %v759_v58 = vld [vmem:[#allocation3 + $0x18] sm:$0xff] (%p1896_p1)  ;;  %v757_v59 = vld [vmem:[#allocation3 + $0x8] sm:$0xff] (%p1896_p1) }
 0x1f6   : > { %v1921_v18 = vpop.eup %1523  ;;  %v742_v62 = vsel (%p1896_p1), %vm726_vm13, 0.0, %v1913_v16  ;;  %vm724_vm14 = vmor (%p1896_p1), %vm707_vm10, %vm723_vm7  ;;  %vm693_vm2 = vcmp.eq.s32.totalorder (%p1896_p1), %v672_v60, %v1950_v34  ;;  %v674_v2 = vadd.s32 (%p1896_p1), %v1945_v29, %v657_v61  ;;  %v659_v3 = vadd.s32 (%p1896_p1), 72, %v1947_v31 }
 0x1f7   : > { %v1923_v19 = vpop.eup %1525  ;;  %776 = vadd.xlane.f32.xlu1 (%p1896_p1), %v742_v62  ;;  %v740_v1 = vsel (%p1896_p1), %vm724_vm14, 0.0, %v1909_v14  ;;  %vm710_vm0 = vmor (%p1896_p1), %vm691_vm12, %vm1961_vm6  ;;  %vm692_vm5 = vcmp.eq.s32.totalorder (%p1896_p1), %v671_v63, %v1950_v34  ;;  %v673_v4 = vadd.s32 (%p1896_p1), %v1945_v29, %v656_v0  ;;  %v658_v42 = vadd.s32 (%p1896_p1), 64, %v1947_v31  ;;  %v761_v62 = vld [vmem:[#allocation3 + $0x28] sm:$0xff] (%p1896_p1)  ;;  %v760_v63 = vld [vmem:[#allocation3 + $0x20] sm:$0xff] (%p1896_p1) }
 0x1f8   : > { %v1925_v20 = vpop.eup %1527  ;;  %772 = vadd.xlane.f32.xlu0 (%p1896_p1), %v740_v1  ;;  %vm727_vm1 = vmor (%p1896_p1), %vm710_vm0, %vm723_vm7  ;;  %vm695_vm10 = vcmp.eq.s32.totalorder (%p1896_p1), %v674_v2, %v1950_v34  ;;  %v676_v46 = vadd.s32 (%p1896_p1), %v1945_v29, %v659_v3  ;;  %v661_v5 = vadd.s32 (%p1896_p1), 88, %v1947_v31  ;;  %v660_v56 = vadd.s32 (%p1896_p1), 80, %v1947_v31 }
 0x1f9   : > { %v1927_v21 = vpop.eup %1529  ;;  %647 = sbr.rel (!%p1896_p1) target bundleno = 677 (0x2a5), region = 40  ;;  %v743_v44 = vsel (%p1896_p1), %vm727_vm1, 0.0, %v1915_v57  ;;  %vm708_vm3 = vmor (%p1896_p1), %vm689_vm15, %vm1961_vm6  ;;  %vm694_vm13 = vcmp.eq.s32.totalorder (%p1896_p1), %v673_v4, %v1950_v34  ;;  %v675_v50 = vadd.s32 (%p1896_p1), %v1945_v29, %v658_v42  ;;  %v663_v8 = vadd.s32 (%p1896_p1), 104, %v1947_v31  ;;  %v762_v4 = vld [vmem:[#allocation3 + $0x30] sm:$0xff] (%p1896_p1) }
 0x1fa   : > { %v1929_v22 = vpop.eup %1531  ;;  %vm725_vm4 = vmor (%p1896_p1), %vm708_vm3, %vm723_vm7  ;;  %vm697_vm0 = vcmp.eq.s32.totalorder (%p1896_p1), %v676_v46, %v1950_v34  ;;  %v678_v7 = vadd.s32 (%p1896_p1), %v1945_v29, %v661_v5  ;;  %v677_v54 = vadd.s32 (%p1896_p1), %v1945_v29, %v660_v56  ;;  %v662_v45 = vadd.s32 (%p1896_p1), 96, %v1947_v31 }
 0x1fb   : > { %v1931_v23 = vpop.eup %1533  ;;  %778 = vadd.xlane.f32.xlu1 (%p1896_p1), %v743_v44  ;;  %v741_v48 = vsel (%p1896_p1), %vm725_vm4, 0.0, %v1911_v15  ;;  %vm712_vm8 = vmor (%p1896_p1), %vm693_vm2, %vm1961_vm6  ;;  %vm696_vm3 = vcmp.eq.s32.totalorder (%p1896_p1), %v675_v50, %v1950_v34  ;;  %v680_v43 = vadd.s32 (%p1896_p1), %v1945_v29, %v663_v8  ;;  %v665_v11 = vadd.s32 (%p1896_p1), 120, %v1947_v31  ;;  %v763_v44 = vld [vmem:[#allocation3 + $0x38] sm:$0xff] (%p1896_p1)  ;;  %v764_v50 = vld [vmem:[#allocation3 + $0x40] sm:$0xff] (%p1896_p1) }
 0x1fc   : > { %v1933_v24 = vpop.eup %1535  ;;  %774 = vadd.xlane.f32.xlu0 (%p1896_p1), %v741_v48  ;;  %vm729_vm9 = vmor (%p1896_p1), %vm712_vm8, %vm723_vm7  ;;  %vm699_vm8 = vcmp.eq.s32.totalorder (%p1896_p1), %v678_v7, %v1950_v34  ;;  %v679_v12 = vadd.s32 (%p1896_p1), %v1945_v29, %v662_v45  ;;  %v664_v47 = vadd.s32 (%p1896_p1), 112, %v1947_v31 }
 0x1fd   : > { %v1935_v25 = vpop.eup %1537  ;;  %v745_v52 = vsel (%p1896_p1), %vm729_vm9, 0.0, %v1919_v17  ;;  %vm711_vm11 = vmor (%p1896_p1), %vm692_vm5, %vm1961_vm6  ;;  %v682_v53 = vadd.s32 (%p1896_p1), %v1945_v29, %v665_v11 }
 0x1fe   : > { %v1937_v26 = vpop.eup %1539  ;;  %vm728_vm12 = vmor (%p1896_p1), %vm711_vm11, %vm723_vm7  ;;  %vm698_vm11 = vcmp.eq.s32.totalorder (%p1896_p1), %v677_v54, %v1950_v34  ;;  %v681_v28 = vadd.s32 (%p1896_p1), %v1945_v29, %v664_v47  ;;  %v766_v54 = vld [vmem:[#allocation3 + $0x50] sm:$0xff] (%p1896_p1) }
 0x1ff   : > { %v1939_v27 = vpop.eup %1541  ;;  %782 = vadd.xlane.f32.xlu1 (%p1896_p1), %v745_v52  ;;  %v744_v6 = vsel (%p1896_p1), %vm728_vm12, 0.0, %v1917_v55  ;;  %vm714_vm14 = vmor (%p1896_p1), %vm695_vm10, %vm1961_vm6  ;;  %v765_v52 = vld [vmem:[#allocation3 + $0x48] sm:$0xff] (%p1896_p1) }
 0x200   : > { %780 = vadd.xlane.f32.xlu0 %v744_v6  ;;  %vm731_vm15 = vmor %vm714_vm14, %vm723_vm7  ;;  %vm701_vm14 = vcmp.eq.s32.totalorder %v680_v43, %v1950_v34 }
 0x201   : > { %v747_v9 = vsel %vm731_vm15, 0.0, %v1923_v19  ;;  %vm713_vm1 = vmor %vm694_vm13, %vm1961_vm6 }
 0x202   : > { %vm730_vm2 = vmor %vm713_vm1, %vm723_vm7  ;;  %vm700_vm1 = vcmp.eq.s32.totalorder %v679_v12, %v1950_v34  ;;  %v768_v12 = vld [vmem:[#allocation3 + $0x60] sm:$0xff] }
 0x203   : > { %786 = vadd.xlane.f32.xlu1 %v747_v9  ;;  %v746_v10 = vsel %vm730_vm2, 0.0, %v1921_v18  ;;  %vm716_vm4 = vmor %vm697_vm0, %vm1961_vm6  ;;  %v767_v9 = vld [vmem:[#allocation3 + $0x58] sm:$0xff] }
 0x204   : > { %784 = vadd.xlane.f32.xlu0 %v746_v10  ;;  %vm733_vm5 = vmor %vm716_vm4, %vm723_vm7  ;;  %vm703_vm4 = vcmp.eq.s32.totalorder %v682_v53, %v1950_v34 }
 0x205   : > { %v749_v49 = vsel %vm733_vm5, 0.0, %v1927_v21  ;;  %vm715_vm9 = vmor %vm696_vm3, %vm1961_vm6 }
 0x206   : > { %vm732_vm10 = vmor %vm715_vm9, %vm723_vm7  ;;  %vm702_vm9 = vcmp.eq.s32.totalorder %v681_v28, %v1950_v34  ;;  %v771_v28 = vld [vmem:[#allocation3 + $0x78] sm:$0xff] }
 0x207   : > { %790 = vadd.xlane.f32.xlu1 %v749_v49  ;;  %v748_v13 = vsel %vm732_vm10, 0.0, %v1925_v20  ;;  %vm718_vm12 = vmor %vm699_vm8, %vm1961_vm6  ;;  %v769_v49 = vld [vmem:[#allocation3 + $0x68] sm:$0xff] }
 0x208   : > { %788 = vadd.xlane.f32.xlu0 %v748_v13  ;;  %vm735_vm13 = vmor %vm718_vm12, %vm723_vm7 }
 0x209   : > { %v751_v51 = vsel %vm735_vm13, 0.0, %v1931_v23  ;;  %vm717_vm15 = vmor %vm698_vm11, %vm1961_vm6 }
 0x20a   : > { %vm734_vm0 = vmor %vm717_vm15, %vm723_vm7 }
 0x20b   : > { %794 = vadd.xlane.f32.xlu1 %v751_v51  ;;  %v750_v30 = vsel %vm734_vm0, 0.0, %v1929_v22  ;;  %vm720_vm2 = vmor %vm701_vm14, %vm1961_vm6  ;;  %vm820_vm14 = vcmask 7168  }
 0x20c   : > { %792 = vadd.xlane.f32.xlu0 %v750_v30  ;;  %vm737_vm3 = vmor %vm720_vm2, %vm723_vm7  ;;  %v770_v30 = vld [vmem:[#allocation3 + $0x70] sm:$0xff] }
 0x20d   : > { %v753_v31 = vsel %vm737_vm3, 0.0, %v1935_v25  ;;  %vm719_vm5 = vmor %vm700_vm1, %vm1961_vm6 }
 0x20e   : > { %vm736_vm8 = vmor %vm719_vm5, %vm723_vm7 }
 0x20f   : > { %798 = vadd.xlane.f32.xlu1 %v753_v31  ;;  %v752_v29 = vsel %vm736_vm8, 0.0, %v1933_v24  ;;  %vm722_vm10 = vmor %vm703_vm4, %vm1961_vm6 }
 0x210   : > { %796 = vadd.xlane.f32.xlu0 %v752_v29  ;;  %vm739_vm11 = vmor %vm722_vm10, %vm723_vm7 }
 0x211   : > { %v755_v32 = vsel %vm739_vm11, 0.0, %v1939_v27  ;;  %vm721_vm12 = vmor %vm702_vm9, %vm1961_vm6 }
 0x212   : > { %vm738_vm13 = vmor %vm721_vm12, %vm723_vm7 }
 0x213   : > { %802 = vadd.xlane.f32.xlu1 %v755_v32  ;;  %v754_v33 = vsel %vm738_vm13, 0.0, %v1937_v26 }
 0x214   : > { %800 = vadd.xlane.f32.xlu0 %v754_v33 }
 0x284   : > { %v777_v37 = vpop.xlane.xlu1 %776 }
 0x285   : > { %v806_v38 = vadd.f32 %v777_v37, %v758_v35  ;;  %v773_v39 = vpop.xlane.xlu0 %772 }
 0x286   : > { %v804_v40 = vadd.f32 %v773_v39, %v756_v36 }
 0x287   : > { %823 = vst.msk [vmem:[#allocation3 + $0x10] sm:$0xff] %vm820_vm14, %v806_v38 }
 0x288   : > { %821 = vst.msk [vmem:[#allocation3] sm:$0xff] %vm820_vm14, %v804_v40  ;;  %v779_v41 = vpop.xlane.xlu1 %778 }
 0x289   : > { %v807_v34 = vadd.f32 %v779_v41, %v759_v58  ;;  %v775_v60 = vpop.xlane.xlu0 %774 }
 0x28a   : > { %v805_v61 = vadd.f32 %v775_v60, %v757_v59 }
 0x28b   : > { %824 = vst.msk [vmem:[#allocation3 + $0x18] sm:$0xff] %vm820_vm14, %v807_v34 }
 0x28c   : > { %822 = vst.msk [vmem:[#allocation3 + $0x8] sm:$0xff] %vm820_vm14, %v805_v61  ;;  %v783_v0 = vpop.xlane.xlu1 %782 }
 0x28d   : > { %v809_v1 = vadd.f32 %v783_v0, %v761_v62  ;;  %v781_v2 = vpop.xlane.xlu0 %780 }
 0x28e   : > { %v808_v3 = vadd.f32 %v781_v2, %v760_v63 }
 0x28f   : > { %826 = vst.msk [vmem:[#allocation3 + $0x28] sm:$0xff] %vm820_vm14, %v809_v1 }
 0x290   : > { %825 = vst.msk [vmem:[#allocation3 + $0x20] sm:$0xff] %vm820_vm14, %v808_v3  ;;  %v787_v42 = vpop.xlane.xlu1 %786 }
 0x291   : > { %v811_v48 = vadd.f32 %v787_v42, %v763_v44  ;;  %v785_v46 = vpop.xlane.xlu0 %784 }
 0x292   : > { %v810_v5 = vadd.f32 %v785_v46, %v762_v4 }
 0x293   : > { %828 = vst.msk [vmem:[#allocation3 + $0x38] sm:$0xff] %vm820_vm14, %v811_v48 }
 0x294   : > { %827 = vst.msk [vmem:[#allocation3 + $0x30] sm:$0xff] %vm820_vm14, %v810_v5  ;;  %v791_v56 = vpop.xlane.xlu1 %790 }
 0x295   : > { %v813_v6 = vadd.f32 %v791_v56, %v765_v52  ;;  %v789_v7 = vpop.xlane.xlu0 %788 }
 0x296   : > { %v812_v8 = vadd.f32 %v789_v7, %v764_v50 }
 0x297   : > { %830 = vst.msk [vmem:[#allocation3 + $0x48] sm:$0xff] %vm820_vm14, %v813_v6 }
 0x298   : > { %829 = vst.msk [vmem:[#allocation3 + $0x40] sm:$0xff] %vm820_vm14, %v812_v8  ;;  %v795_v45 = vpop.xlane.xlu1 %794 }
 0x299   : > { %v815_v10 = vadd.f32 %v795_v45, %v767_v9  ;;  %v793_v43 = vpop.xlane.xlu0 %792 }
 0x29a   : > { %v814_v11 = vadd.f32 %v793_v43, %v766_v54 }
 0x29b   : > { %832 = vst.msk [vmem:[#allocation3 + $0x58] sm:$0xff] %vm820_vm14, %v815_v10 }
 0x29c   : > { %831 = vst.msk [vmem:[#allocation3 + $0x50] sm:$0xff] %vm820_vm14, %v814_v11  ;;  %v799_v47 = vpop.xlane.xlu1 %798 }
 0x29d   : > { %v817_v13 = vadd.f32 %v799_v47, %v769_v49  ;;  %v797_v53 = vpop.xlane.xlu0 %796 }
 0x29e   : > { %v816_v51 = vadd.f32 %v797_v53, %v768_v12 }
 0x29f   : > { %834 = vst.msk [vmem:[#allocation3 + $0x68] sm:$0xff] %vm820_vm14, %v817_v13 }
 0x2a0   : > { %833 = vst.msk [vmem:[#allocation3 + $0x60] sm:$0xff] %vm820_vm14, %v816_v51  ;;  %v803_v31 = vpop.xlane.xlu1 %802 }
 0x2a1   : > { %v819_v29 = vadd.f32 %v803_v31, %v771_v28  ;;  %v801_v32 = vpop.xlane.xlu0 %800 }
 0x2a2   : > { %v818_v33 = vadd.f32 %v801_v32, %v770_v30 }
 0x2a3   : > { %836 = vst.msk [vmem:[#allocation3 + $0x78] sm:$0xff] %vm820_vm14, %v819_v29 }
 0x2a4   : > { %835 = vst.msk [vmem:[#allocation3 + $0x70] sm:$0xff] %vm820_vm14, %v818_v33 }
 0x2a5 PF: > { %839 = sbr.rel (%p1896_p1) target bundleno = 850 (0x352), region = 44  ;;  %860 = vadd.xlane.f32.xlu1 (!%p1896_p1), %v1913_v16  ;;  %856 = vadd.xlane.f32.xlu0 (!%p1896_p1), %v1909_v14  ;;  %v842_v14 = vld [vmem:[#allocation3 + $0x10] sm:$0xff] (!%p1896_p1)  ;;  %vm904_vm6 = vcmask (!%p1896_p1), 7168   ;;  %v847_v37 = vld [vmem:[#allocation3 + $0x38] sm:$0xff] (!%p1896_p1)  ;;  %v849_v41 = vld [vmem:[#allocation3 + $0x48] sm:$0xff] (!%p1896_p1) }
 0x2a6   : > { %v846_v38 = vld [vmem:[#allocation3 + $0x30] sm:$0xff] (!%p1896_p1)  ;;  %v848_v34 = vld [vmem:[#allocation3 + $0x40] sm:$0xff] (!%p1896_p1)  ;;  %v851_v0 = vld [vmem:[#allocation3 + $0x58] sm:$0xff] (!%p1896_p1) }
 0x2a7   : > { %v850_v1 = vld [vmem:[#allocation3 + $0x50] sm:$0xff] (!%p1896_p1)  ;;  %v853_v42 = vld [vmem:[#allocation3 + $0x68] sm:$0xff] (!%p1896_p1)  ;;  %v852_v48 = vld [vmem:[#allocation3 + $0x60] sm:$0xff] (!%p1896_p1) }
 0x2a9   : > { %862 = vadd.xlane.f32.xlu1 (!%p1896_p1), %v1915_v57  ;;  %858 = vadd.xlane.f32.xlu0 (!%p1896_p1), %v1911_v15  ;;  %v840_v15 = vld [vmem:[#allocation3] sm:$0xff] (!%p1896_p1) }
 0x2aa   : > { %v855_v56 = vld [vmem:[#allocation3 + $0x78] sm:$0xff] (!%p1896_p1) }
 0x2ab   : > { %v854_v6 = vld [vmem:[#allocation3 + $0x70] sm:$0xff] (!%p1896_p1) }
 0x2ad   : > { %866 = vadd.xlane.f32.xlu1 %v1919_v17  ;;  %864 = vadd.xlane.f32.xlu0 %v1917_v55 }
 0x2b1   : > { %870 = vadd.xlane.f32.xlu1 %v1923_v19  ;;  %868 = vadd.xlane.f32.xlu0 %v1921_v18  ;;  %v843_v18 = vld [vmem:[#allocation3 + $0x18] sm:$0xff]  ;;  %v841_v19 = vld [vmem:[#allocation3 + $0x8] sm:$0xff] }
 0x2b5   : > { %874 = vadd.xlane.f32.xlu1 %v1927_v21  ;;  %872 = vadd.xlane.f32.xlu0 %v1925_v20 }
 0x2b9   : > { %878 = vadd.xlane.f32.xlu1 %v1931_v23  ;;  %876 = vadd.xlane.f32.xlu0 %v1929_v22 }
 0x2bd   : > { %882 = vadd.xlane.f32.xlu1 %v1935_v25  ;;  %880 = vadd.xlane.f32.xlu0 %v1933_v24  ;;  %v845_v24 = vld [vmem:[#allocation3 + $0x28] sm:$0xff]  ;;  %v844_v25 = vld [vmem:[#allocation3 + $0x20] sm:$0xff] }
 0x2c1   : > { %886 = vadd.xlane.f32.xlu1 %v1939_v27  ;;  %884 = vadd.xlane.f32.xlu0 %v1937_v26 }
 0x332   : > { %v861_v16 = vpop.xlane.xlu1 %860  ;;  %v857_v57 = vpop.xlane.xlu0 %856 }
 0x333   : > { %v890_v55 = vadd.f32 %v861_v16, %v842_v14  ;;  %v888_v17 = vadd.f32 %v857_v57, %v840_v15 }
 0x335   : > { %907 = vst.msk [vmem:[#allocation3 + $0x10] sm:$0xff] %vm904_vm6, %v890_v55  ;;  %905 = vst.msk [vmem:[#allocation3] sm:$0xff] %vm904_vm6, %v888_v17 }
 0x336   : > { %v863_v20 = vpop.xlane.xlu1 %862  ;;  %v859_v21 = vpop.xlane.xlu0 %858 }
 0x337   : > { %v891_v22 = vadd.f32 %v863_v20, %v843_v18  ;;  %v889_v23 = vadd.f32 %v859_v21, %v841_v19 }
 0x339   : > { %908 = vst.msk [vmem:[#allocation3 + $0x18] sm:$0xff] %vm904_vm6, %v891_v22  ;;  %906 = vst.msk [vmem:[#allocation3 + $0x8] sm:$0xff] %vm904_vm6, %v889_v23 }
 0x33a   : > { %v867_v26 = vpop.xlane.xlu1 %866  ;;  %v865_v27 = vpop.xlane.xlu0 %864 }
 0x33b   : > { %v893_v35 = vadd.f32 %v867_v26, %v845_v24  ;;  %v892_v36 = vadd.f32 %v865_v27, %v844_v25 }
 0x33d   : > { %910 = vst.msk [vmem:[#allocation3 + $0x28] sm:$0xff] %vm904_vm6, %v893_v35  ;;  %909 = vst.msk [vmem:[#allocation3 + $0x20] sm:$0xff] %vm904_vm6, %v892_v36 }
 0x33e   : > { %v871_v39 = vpop.xlane.xlu1 %870  ;;  %v869_v40 = vpop.xlane.xlu0 %868 }
 0x33f   : > { %v895_v58 = vadd.f32 %v871_v39, %v847_v37  ;;  %v894_v59 = vadd.f32 %v869_v40, %v846_v38 }
 0x341   : > { %912 = vst.msk [vmem:[#allocation3 + $0x38] sm:$0xff] %vm904_vm6, %v895_v58  ;;  %911 = vst.msk [vmem:[#allocation3 + $0x30] sm:$0xff] %vm904_vm6, %v894_v59 }
 0x342   : > { %v875_v60 = vpop.xlane.xlu1 %874  ;;  %v873_v61 = vpop.xlane.xlu0 %872 }
 0x343   : > { %v897_v62 = vadd.f32 %v875_v60, %v849_v41  ;;  %v896_v63 = vadd.f32 %v873_v61, %v848_v34 }
 0x345   : > { %914 = vst.msk [vmem:[#allocation3 + $0x48] sm:$0xff] %vm904_vm6, %v897_v62  ;;  %913 = vst.msk [vmem:[#allocation3 + $0x40] sm:$0xff] %vm904_vm6, %v896_v63 }
 0x346   : > { %v879_v2 = vpop.xlane.xlu1 %878  ;;  %v877_v3 = vpop.xlane.xlu0 %876 }
 0x347   : > { %v899_v44 = vadd.f32 %v879_v2, %v851_v0  ;;  %v898_v4 = vadd.f32 %v877_v3, %v850_v1 }
 0x349   : > { %916 = vst.msk [vmem:[#allocation3 + $0x58] sm:$0xff] %vm904_vm6, %v899_v44  ;;  %915 = vst.msk [vmem:[#allocation3 + $0x50] sm:$0xff] %vm904_vm6, %v898_v4 }
 0x34a   : > { %v883_v46 = vpop.xlane.xlu1 %882  ;;  %v881_v5 = vpop.xlane.xlu0 %880 }
 0x34b   : > { %v901_v52 = vadd.f32 %v883_v46, %v853_v42  ;;  %v900_v50 = vadd.f32 %v881_v5, %v852_v48 }
 0x34d   : > { %918 = vst.msk [vmem:[#allocation3 + $0x68] sm:$0xff] %vm904_vm6, %v901_v52  ;;  %917 = vst.msk [vmem:[#allocation3 + $0x60] sm:$0xff] %vm904_vm6, %v900_v50 }
 0x34e   : > { %v887_v7 = vpop.xlane.xlu1 %886  ;;  %v885_v8 = vpop.xlane.xlu0 %884 }
 0x34f   : > { %v903_v9 = vadd.f32 %v887_v7, %v855_v56  ;;  %v902_v54 = vadd.f32 %v885_v8, %v854_v6 }
 0x351   : > { %920 = vst.msk [vmem:[#allocation3 + $0x78] sm:$0xff] %vm904_vm6, %v903_v9  ;;  %919 = vst.msk [vmem:[#allocation3 + $0x70] sm:$0xff] %vm904_vm6, %v902_v54 }
 0x352 PF: > { %p1314_p2 = scmp.ne.s32.totalorder %s1597_s9, 1 }
 0x353   : > { %v924_v45 = vld [vmem:[#allocation3] sm:$0xff] (!%p1314_p2)  ;;  %s1315_s17 = sshll.u32 (!%p1314_p2), %s1601_s10, 7  ;;  %v1021_v10 = vlaneseq (!%p1314_p2)  ;;  %v925_v43 = vld [vmem:[#allocation3 + $0x8] sm:$0xff] (!%p1314_p2)  ;;  %v926_v49 = vld [vmem:[#allocation3 + $0x10] sm:$0xff] (!%p1314_p2)  ;;  %vm1151_vm4 = vcmask (!%p1314_p2), 7168  }
 0x354   : > { %923 = sbr.rel (%p1314_p2) target bundleno = 900 (0x384), region = 48  ;;  %1543 = vlog2.f32 (!%p1314_p2), %v924_v45  ;;  %v2138_v11 = vstv (!%p1314_p2), %s1315_s17  ;;  %v927_v47 = vld [vmem:[#allocation3 + $0x18] sm:$0xff] (!%p1314_p2)  ;;  %v928_v13 = vld [vmem:[#allocation3 + $0x20] sm:$0xff] (!%p1314_p2)  ;;  %v929_v30 = vld [vmem:[#allocation3 + $0x28] sm:$0xff] (!%p1314_p2) }
 0x355   : > { %v2140_v12 = vshrl.u32 (!%p1314_p2), %v1021_v10, 7  ;;  %1545 = vlog2.f32 (!%p1314_p2), %v925_v43  ;;  %v930_v17 = vld [vmem:[#allocation3 + $0x30] sm:$0xff] (!%p1314_p2)  ;;  %v931_v19 = vld [vmem:[#allocation3 + $0x38] sm:$0xff] (!%p1314_p2)  ;;  %v932_v26 = vld [vmem:[#allocation3 + $0x40] sm:$0xff] (!%p1314_p2) }
 0x356   : > { %1547 = vlog2.f32 (!%p1314_p2), %v926_v49  ;;  %v988_v35 = vld [vmem:[#allocation4] sm:$0xff] (!%p1314_p2)  ;;  %v989_v59 = vld [vmem:[#allocation4 + $0x8] sm:$0xff] (!%p1314_p2)  ;;  %v990_v62 = vld [vmem:[#allocation4 + $0x10] sm:$0xff] (!%p1314_p2) }
 0x357   : > { %v1039_v53 = vadd.s32 (!%p1314_p2), %v2138_v11, %v2140_v12  ;;  %v1023_v51 = vadd.s32 (!%p1314_p2), 8, %v2140_v12  ;;  %v1024_v28 = vadd.s32 (!%p1314_p2), 16, %v2140_v12  ;;  %1549 = vlog2.f32 (!%p1314_p2), %v927_v47  ;;  %v991_v44 = vld [vmem:[#allocation4 + $0x18] sm:$0xff] (!%p1314_p2)  ;;  %v992_v56 = vld [vmem:[#allocation4 + $0x20] sm:$0xff] (!%p1314_p2) }
 0x358   : > { %v1025_v31 = vadd.s32 (!%p1314_p2), 24, %v2140_v12  ;;  %1551 = vlog2.f32 (!%p1314_p2), %v928_v13  ;;  %v1026_v29 = vadd.s32 (!%p1314_p2), 32, %v2140_v12  ;;  %v1027_v32 = vadd.s32 (!%p1314_p2), 40, %v2140_v12  ;;  %v993_v13 = vld [vmem:[#allocation4 + $0x28] sm:$0xff] (!%p1314_p2)  ;;  %v935_v57 = vld [vmem:[#allocation3 + $0x58] sm:$0xff] (!%p1314_p2)  ;;  %v996_v34 = vld [vmem:[#allocation4 + $0x40] sm:$0xff] (!%p1314_p2) }
 0x359   : > { %vm1071_vm7 = vcmp.ge.s32.totalorder (!%p1314_p2), %v1039_v53, 128  ;;  %vm1087_vm15 = vcmp.lt.s32.totalorder (!%p1314_p2), %v1039_v53, 132  ;;  %v1040_v33 = vadd.s32 (!%p1314_p2), %v2138_v11, %v1023_v51  ;;  %v1041_v14 = vadd.s32 (!%p1314_p2), %v2138_v11, %v1024_v28 }
 0x35a   : > { %v1042_v15 = vadd.s32 (!%p1314_p2), %v2138_v11, %v1025_v31  ;;  %v2153_v16 = vadd.s32 (!%p1314_p2), %v2138_v11, %v1026_v29  ;;  %1553 = vlog2.f32 (!%p1314_p2), %v929_v30  ;;  %vm1055_vm0 = vcmp.lt.s32.totalorder (!%p1314_p2), %v1039_v53, 4  ;;  %vm2155_vm1 = vmand (!%p1314_p2), %vm1071_vm7, %vm1087_vm15  ;;  %v933_v53 = vld [vmem:[#allocation3 + $0x48] sm:$0xff] (!%p1314_p2)  ;;  %v934_v31 = vld [vmem:[#allocation3 + $0x50] sm:$0xff] (!%p1314_p2) }
 0x35b   : > { %vm1072_vm2 = vcmp.ge.s32.totalorder %v1040_v33, 128  ;;  %vm1088_vm3 = vcmp.lt.s32.totalorder %v1040_v33, 132  ;;  %v2160_v55 = vadd.s32 %v2138_v11, %v1027_v32  ;;  %vm1073_vm5 = vcmp.ge.s32.totalorder %v1041_v14, 128  ;;  %vm2169_vm14 = vmor %vm1055_vm0, %vm2155_vm1  ;;  %v999_v32 = vld [vmem:[#allocation4 + $0x58] sm:$0xff] }
 0x35c   : > { %vm1089_vm8 = vcmp.lt.s32.totalorder %v1041_v14, 132  ;;  %vm1056_vm9 = vcmp.lt.s32.totalorder %v1040_v33, 4  ;;  %vm2162_vm10 = vmand %vm1072_vm2, %vm1088_vm3  ;;  %vm1057_vm11 = vcmp.lt.s32.totalorder %v1041_v14, 4  ;;  %vm1058_vm12 = vcmp.lt.s32.totalorder %v1042_v15, 4 }
 0x35d   : > { %vm1074_vm13 = vcmp.ge.s32.totalorder %v1042_v15, 128  ;;  %vm1090_vm6 = vcmp.lt.s32.totalorder %v1042_v15, 132  ;;  %vm1059_vm7 = vcmp.lt.s32.totalorder %v2153_v16, 4  ;;  %vm1075_vm15 = vcmp.ge.s32.totalorder %v2153_v16, 128  ;;  %vm2178_vm3 = vmand %vm1073_vm5, %vm1089_vm8 }
 0x35e   : > { %v1544_v20 = vpop.eup %1543  ;;  %vm1091_vm2 = vcmp.lt.s32.totalorder %v2153_v16, 132  ;;  %vm1060_vm0 = vcmp.lt.s32.totalorder %v2160_v55, 4  ;;  %1555 = vlog2.f32 %v930_v17  ;;  %v1028_v25 = vadd.s32 48, %v2140_v12  ;;  %vm2187_vm1 = vmor %vm1056_vm9, %vm2162_vm10  ;;  %v1000_v16 = vld [vmem:[#allocation4 + $0x60] sm:$0xff] }
 0x35f   : > { %v1546_v22 = vpop.eup %1545  ;;  %v941_v23 = vmul.f32 0.6931472, %v1544_v20  ;;  %1557 = vlog2.f32 %v931_v19  ;;  %v1029_v38 = vadd.s32 56, %v2140_v12  ;;  %v1030_v39 = vadd.s32 64, %v2140_v12  ;;  %vm2195_vm5 = vmand %vm1074_vm13, %vm1090_vm6  ;;  %v936_v20 = vld [vmem:[#allocation3 + $0x60] sm:$0xff] }
 0x360   : > { %v1548_v27 = vpop.eup %1547  ;;  %v943_v36 = vmul.f32 0.6931472, %v1546_v22  ;;  %vm1076_vm8 = vcmp.ge.s32.totalorder %v2160_v55, 128  ;;  %vm1092_vm9 = vcmp.lt.s32.totalorder %v2160_v55, 132  ;;  %vm2204_vm10 = vmor %vm1057_vm11, %vm2178_vm3  ;;  %v2209_v1 = vadd.s32 %v2138_v11, %v1028_v25  ;;  %v994_v22 = vld [vmem:[#allocation4 + $0x30] sm:$0xff] }
 0x361   : > { %v1550_v40 = vpop.eup %1549  ;;  %v972_v58 = vadd.f32 2.0, %v941_v23  ;;  %v945_v41 = vmul.f32 0.6931472, %v1548_v27  ;;  %1559 = vlog2.f32 %v932_v26  ;;  %vm2215_vm13 = vmand %vm1075_vm15, %vm1091_vm2  ;;  %v1031_v48 = vadd.s32 72, %v2140_v12 }
 0x362   : > { %v1552_v60 = vpop.eup %1551  ;;  %v973_v61 = vadd.f32 2.0, %v943_v36  ;;  %v947_v0 = vmul.f32 0.6931472, %v1550_v40  ;;  %vm2223_vm11 = vmor %vm1058_vm12, %vm2195_vm5  ;;  %v1046_v6 = vadd.s32 %v2138_v11, %v1029_v38  ;;  %v2229_v7 = vadd.s32 %v2138_v11, %v1030_v39  ;;  %v995_v36 = vld [vmem:[#allocation4 + $0x38] sm:$0xff] }
 0x363   : > { %v1004_v2 = vsub.f32 %v972_v58, %v988_v35  ;;  %v974_v3 = vadd.f32 2.0, %v945_v41  ;;  %v949_v4 = vmul.f32 0.6931472, %v1552_v60  ;;  %vm2237_vm12 = vmand %vm1076_vm8, %vm1092_vm9  ;;  %vm1077_vm6 = vcmp.ge.s32.totalorder %v2209_v1, 128  ;;  %v937_v58 = vld [vmem:[#allocation3 + $0x68] sm:$0xff]  ;;  %v938_v60 = vld [vmem:[#allocation3 + $0x70] sm:$0xff] }
 0x364   : > { %v1554_v46 = vpop.eup %1553  ;;  %v1005_v5 = vsub.f32 %v973_v61, %v989_v59  ;;  %v975_v52 = vadd.f32 2.0, %v947_v0  ;;  %vm1093_vm15 = vcmp.lt.s32.totalorder %v2209_v1, 132  ;;  %vm1061_vm2 = vcmp.lt.s32.totalorder %v2209_v1, 4  ;;  %v939_v0 = vld [vmem:[#allocation3 + $0x78] sm:$0xff] }
 0x365   : > { %v1135_v8 = vsel %vm2169_vm14, %v1004_v2, 0.0  ;;  %v1006_v9 = vsub.f32 %v974_v3, %v990_v62  ;;  %v976_v54 = vadd.f32 2.0, %v949_v4  ;;  %v951_v45 = vmul.f32 0.6931472, %v1554_v46  ;;  %vm2249_vm14 = vmor %vm1059_vm7, %vm2215_vm13 }
 0x366   : > { %1152 = vst.msk [vmem:[%s1681_s28] sm:$0xff] %vm1151_vm4, %v1135_v8  ;;  %v1136_v43 = vsel %vm2187_vm1, %v1005_v5, 0.0  ;;  %v1007_v49 = vsub.f32 %v975_v52, %v991_v44  ;;  %vm2268_vm7 = vmor %vm1060_vm0, %vm2237_vm12  ;;  %vm1078_vm3 = vcmp.ge.s32.totalorder %v1046_v6, 128  ;;  %vm1094_vm1 = vcmp.lt.s32.totalorder %v1046_v6, 132 }
 0x367   : > { %1153 = vst.msk [vmem:[%s1681_s28 + $0x8] sm:$0xff] %vm1151_vm4, %v1136_v43  ;;  %v1137_v51 = vsel %vm2204_vm10, %v1006_v9, 0.0  ;;  %v1008_v28 = vsub.f32 %v976_v54, %v992_v56  ;;  %v977_v30 = vadd.f32 2.0, %v951_v45  ;;  %vm1079_vm5 = vcmp.ge.s32.totalorder %v2229_v7, 128  ;;  %vm2281_vm8 = vmand %vm1077_vm6, %vm1093_vm15  ;;  %v997_v9 = vld [vmem:[#allocation4 + $0x48] sm:$0xff]  ;;  %v998_v43 = vld [vmem:[#allocation4 + $0x50] sm:$0xff] }
 0x368   : > { %1154 = vst.msk [vmem:[%s1681_s28 + $0x10] sm:$0xff] %vm1151_vm4, %v1137_v51  ;;  %v1138_v29 = vsel %vm2223_vm11, %v1007_v49, 0.0  ;;  %v1556_v33 = vpop.eup %1555  ;;  %vm1095_vm0 = vcmp.lt.s32.totalorder %v2229_v7, 132  ;;  %1561 = vlog2.f32 %v933_v53  ;;  %v1048_v18 = vadd.s32 %v2138_v11, %v1031_v48  ;;  %vm2294_vm10 = vmand %vm1078_vm3, %vm1094_vm1 }
 0x369   : > { %1155 = vst.msk [vmem:[%s1681_s28 + $0x18] sm:$0xff] %vm1151_vm4, %v1138_v29  ;;  %v1139_v14 = vsel %vm2249_vm14, %v1008_v28, 0.0  ;;  %v1009_v15 = vsub.f32 %v977_v30, %v993_v13  ;;  %v1558_v55 = vpop.eup %1557  ;;  %v953_v17 = vmul.f32 0.6931472, %v1556_v33  ;;  %1563 = vlog2.f32 %v934_v31  ;;  %vm2305_vm13 = vmor %vm1061_vm2, %vm2281_vm8 }
 0x36a   : > { %1156 = vst.msk [vmem:[%s1681_s28 + $0x20] sm:$0xff] %vm1151_vm4, %v1139_v14  ;;  %v1032_v19 = vadd.s32 80, %v2140_v12  ;;  %v955_v23 = vmul.f32 0.6931472, %v1558_v55  ;;  %vm1062_vm9 = vcmp.lt.s32.totalorder %v1046_v6, 4  ;;  %v1033_v25 = vadd.s32 88, %v2140_v12  ;;  %vm2317_vm12 = vmand %vm1079_vm5, %vm1095_vm0 }
 0x36b   : > { %v1140_v21 = vsel %vm2268_vm7, %v1009_v15, 0.0  ;;  %v1560_v26 = vpop.eup %1559  ;;  %v978_v27 = vadd.f32 2.0, %v953_v17  ;;  %1565 = vlog2.f32 %v935_v57  ;;  %vm1063_vm11 = vcmp.lt.s32.totalorder %v2229_v7, 4  ;;  %vm2324_vm14 = vmor %vm1062_vm9, %vm2294_vm10 }
 0x36c   : > { %1157 = vst.msk [vmem:[%s1681_s28 + $0x28] sm:$0xff] %vm1151_vm4, %v1140_v21  ;;  %v2310_v37 = vadd.s32 %v2138_v11, %v1032_v19  ;;  %v979_v38 = vadd.f32 2.0, %v955_v23  ;;  %v957_v39 = vmul.f32 0.6931472, %v1560_v26  ;;  %1567 = vlog2.f32 %v936_v20  ;;  %vm2336_vm3 = vmor %vm1063_vm11, %vm2317_vm12  ;;  %v1001_v26 = vld [vmem:[#allocation4 + $0x68] sm:$0xff] }
 0x36d   : > { %v1010_v59 = vsub.f32 %v978_v27, %v994_v22  ;;  %vm1064_vm6 = vcmp.lt.s32.totalorder %v1048_v18, 4  ;;  %vm1080_vm15 = vcmp.ge.s32.totalorder %v1048_v18, 128  ;;  %vm1096_vm2 = vcmp.lt.s32.totalorder %v1048_v18, 132 }
 0x36e   : > { %v1011_v61 = vsub.f32 %v979_v38, %v995_v36  ;;  %v980_v62 = vadd.f32 2.0, %v957_v39  ;;  %vm1081_vm7 = vcmp.ge.s32.totalorder %v2310_v37, 128  ;;  %v1050_v63 = vadd.s32 %v2138_v11, %v1033_v25  ;;  %vm2348_vm5 = vmand %vm1080_vm15, %vm1096_vm2 }
 0x36f   : > { %v1141_v1 = vsel %vm2305_vm13, %v1010_v59, 0.0  ;;  %vm1097_vm1 = vcmp.lt.s32.totalorder %v2310_v37, 132  ;;  %v1034_v3 = vadd.s32 96, %v2140_v12  ;;  %1569 = vlog2.f32 %v937_v58  ;;  %vm2365_vm9 = vmor %vm1064_vm6, %vm2348_vm5  ;;  %v1003_v58 = vld [vmem:[#allocation4 + $0x78] sm:$0xff] }
 0x370   : > { %1158 = vst.msk [vmem:[%s1681_s28 + $0x30] sm:$0xff] %vm1151_vm4, %v1141_v1  ;;  %v1142_v44 = vsel %vm2324_vm14, %v1011_v61, 0.0  ;;  %v1012_v4 = vsub.f32 %v980_v62, %v996_v34  ;;  %v1035_v48 = vadd.s32 104, %v2140_v12  ;;  %1571 = vlog2.f32 %v938_v60  ;;  %vm1113_vm12 = vmand %vm1081_vm7, %vm1097_vm1 }
 0x371   : > { %1159 = vst.msk [vmem:[%s1681_s28 + $0x38] sm:$0xff] %vm1151_vm4, %v1142_v44  ;;  %v1051_v46 = vadd.s32 %v2138_v11, %v1034_v3  ;;  %v1036_v5 = vadd.s32 112, %v2140_v12  ;;  %1573 = vlog2.f32 %v939_v0  ;;  %v1037_v52 = vadd.s32 120, %v2140_v12 }
 0x372   : > { %v1562_v50 = vpop.eup %1561  ;;  %v1143_v56 = vsel %vm2336_vm3, %v1012_v4, 0.0  ;;  %vm1082_vm8 = vcmp.ge.s32.totalorder %v1050_v63, 128  ;;  %vm1098_vm0 = vcmp.lt.s32.totalorder %v1050_v63, 132  ;;  %v1052_v12 = vadd.s32 %v2138_v11, %v1035_v48 }
 0x373   : > { %v1564_v6 = vpop.eup %1563  ;;  %1160 = vst.msk [vmem:[%s1681_s28 + $0x40] sm:$0xff] %vm1151_vm4, %v1143_v56  ;;  %v959_v7 = vmul.f32 0.6931472, %v1562_v50  ;;  %vm1083_vm10 = vcmp.ge.s32.totalorder %v1051_v46, 128  ;;  %vm1099_vm13 = vcmp.lt.s32.totalorder %v1051_v46, 132  ;;  %vm1065_vm11 = vcmp.lt.s32.totalorder %v2310_v37, 4  ;;  %vm2377_vm6 = vmand %vm1082_vm8, %vm1098_vm0 }
 0x374   : > { %v961_v54 = vmul.f32 0.6931472, %v1564_v6  ;;  %vm1066_vm14 = vcmp.lt.s32.totalorder %v1050_v63, 4  ;;  %v1053_v47 = vadd.s32 %v2138_v11, %v1036_v5  ;;  %v1054_v13 = vadd.s32 %v2138_v11, %v1037_v52  ;;  %vm2385_vm2 = vmand %vm1083_vm10, %vm1099_vm13  ;;  %v1002_v37 = vld [vmem:[#allocation4 + $0x70] sm:$0xff] }
 0x375   : > { %v1566_v45 = vpop.eup %1565  ;;  %v981_v10 = vadd.f32 2.0, %v959_v7  ;;  %vm1067_vm15 = vcmp.lt.s32.totalorder %v1051_v46, 4  ;;  %vm2391_vm7 = vmor %vm1065_vm11, %vm1113_vm12  ;;  %vm1084_vm3 = vcmp.ge.s32.totalorder %v1052_v12, 128  ;;  %vm1100_vm1 = vcmp.lt.s32.totalorder %v1052_v12, 132 }
 0x376   : > { %v1568_v53 = vpop.eup %1567  ;;  %v982_v51 = vadd.f32 2.0, %v961_v54  ;;  %v963_v28 = vmul.f32 0.6931472, %v1566_v45  ;;  %vm2398_vm5 = vmor %vm1066_vm14, %vm2377_vm6  ;;  %vm1085_vm8 = vcmp.ge.s32.totalorder %v1053_v47, 128  ;;  %vm1101_vm0 = vcmp.lt.s32.totalorder %v1053_v47, 132 }
 0x377   : > { %v1013_v31 = vsub.f32 %v981_v10, %v997_v9  ;;  %v965_v33 = vmul.f32 0.6931472, %v1568_v53  ;;  %vm2407_vm10 = vmor %vm1067_vm15, %vm2385_vm2  ;;  %vm1086_vm13 = vcmp.ge.s32.totalorder %v1054_v13, 128  ;;  %vm1102_vm11 = vcmp.lt.s32.totalorder %v1054_v13, 132 }
 0x378   : > { %v1014_v11 = vsub.f32 %v982_v51, %v998_v43  ;;  %v983_v14 = vadd.f32 2.0, %v963_v28  ;;  %vm2417_vm12 = vmand %vm1084_vm3, %vm1100_vm1  ;;  %vm1069_vm14 = vcmp.lt.s32.totalorder %v1053_v47, 4  ;;  %vm1070_vm15 = vcmp.lt.s32.totalorder %v1054_v13, 4 }
 0x379   : > { %v1570_v57 = vpop.eup %1569  ;;  %v1144_v55 = vsel %vm2365_vm9, %v1013_v31, 0.0  ;;  %v984_v17 = vadd.f32 2.0, %v965_v33  ;;  %vm1068_vm9 = vcmp.lt.s32.totalorder %v1052_v12, 4  ;;  %vm1117_vm6 = vmand %vm1085_vm8, %vm1101_vm0 }
 0x37a   : > { %v1572_v19 = vpop.eup %1571  ;;  %1161 = vst.msk [vmem:[%s1681_s28 + $0x48] sm:$0xff] %vm1151_vm4, %v1144_v55  ;;  %v1145_v20 = vsel %vm2391_vm7, %v1014_v11, 0.0  ;;  %v1015_v21 = vsub.f32 %v983_v14, %v999_v32  ;;  %v967_v22 = vmul.f32 0.6931472, %v1570_v57  ;;  %vm1118_vm2 = vmand %vm1086_vm13, %vm1102_vm11 }
 0x37b   : > { %v1574_v24 = vpop.eup %1573  ;;  %1162 = vst.msk [vmem:[%s1681_s28 + $0x50] sm:$0xff] %vm1151_vm4, %v1145_v20  ;;  %v1016_v25 = vsub.f32 %v984_v17, %v1000_v16  ;;  %v969_v27 = vmul.f32 0.6931472, %v1572_v19  ;;  %vm1132_vm7 = vmor %vm1068_vm9, %vm2417_vm12 }
 0x37c   : > { %v1146_v35 = vsel %vm2398_vm5, %v1015_v21, 0.0  ;;  %v985_v36 = vadd.f32 2.0, %v967_v22  ;;  %v971_v38 = vmul.f32 0.6931472, %v1574_v24  ;;  %vm1133_vm3 = vmor %vm1069_vm14, %vm1117_vm6 }
 0x37d   : > { %1163 = vst.msk [vmem:[%s1681_s28 + $0x58] sm:$0xff] %vm1151_vm4, %v1146_v35  ;;  %v1147_v39 = vsel %vm2407_vm10, %v1016_v25, 0.0  ;;  %v986_v40 = vadd.f32 2.0, %v969_v27  ;;  %vm1134_vm1 = vmor %vm1070_vm15, %vm1118_vm2 }
 0x37e   : > { %1164 = vst.msk [vmem:[%s1681_s28 + $0x60] sm:$0xff] %vm1151_vm4, %v1147_v39  ;;  %v1017_v59 = vsub.f32 %v985_v36, %v1001_v26  ;;  %v987_v41 = vadd.f32 2.0, %v971_v38 }
 0x37f   : > { %v1018_v34 = vsub.f32 %v986_v40, %v1002_v37 }
 0x380   : > { %v1148_v60 = vsel %vm1132_vm7, %v1017_v59, 0.0  ;;  %v1019_v61 = vsub.f32 %v987_v41, %v1003_v58 }
 0x381   : > { %1165 = vst.msk [vmem:[%s1681_s28 + $0x68] sm:$0xff] %vm1151_vm4, %v1148_v60  ;;  %v1149_v62 = vsel %vm1133_vm3, %v1018_v34, 0.0 }
 0x382   : > { %1166 = vst.msk [vmem:[%s1681_s28 + $0x70] sm:$0xff] %vm1151_vm4, %v1149_v62  ;;  %v1150_v63 = vsel %vm1134_vm1, %v1019_v61, 0.0 }
 0x383   : > { %1167 = vst.msk [vmem:[%s1681_s28 + $0x78] sm:$0xff] %vm1151_vm4, %v1150_v63 }
 0x384 PF: > { %s12_s13 = sadd.s32 1, %s1613_s13   ;;  %s2520_s9 = smov %s1605_s11 }
 0x385   : > { %p9_p3 = scmp.ge.s32.totalorder %s12_s13, 6   ;;  %s2521_s10 = smov %s1609_s12 }
 0x386   : > { %s2522_s11 = smov %s2525_s14  ;;  %s2523_s12 = smov %s2529_s15 }
 0x387   :  { %11 = sbr.rel (!%p9_p3) target bundleno = 3 (0x3), region = 81 }

</bundles_post_ra>
